<compile_context>
chip_gen: v7x
topology: tpu7x:2x2x1
jax: 0.10.0
libtpu: 0.0.40
codegen_flags: <defaults>
</compile_context>

<pallas_src>
import functools

import jax
import jax.numpy as jnp
from jax import lax
from jax.experimental import pallas as pl
from jax.experimental.pallas import tpu as pltpu

KH = KW = 5
PAD = 2
EPS = 1e-5


def _head_kernel(x_ref, wdw_ref, b1_ref, wpw_ref, b2_ref, out_ref, *, H, W):
    """Fused depthwise-5x5 + BN1 + ReLU + pointwise-1x1 + BN2 for one image.

    x_ref   : (1, C, H*W)   input image, channel-major, flattened spatial on lanes
    wdw_ref : (C, 25)       depthwise weights (BN1 scale pre-folded)
    b1_ref  : (C, 1)        folded BN1 bias
    wpw_ref : (Cout, C)     pointwise weights (BN2 scale pre-folded)
    b2_ref  : (Cout, 1)     folded BN2 bias
    out_ref : (1, Cout, H*W)
    """
    HW = H * W
    C = x_ref.shape[1]
    Cout = out_ref.shape[1]

    xf = x_ref[0]                                   # (C, HW)
    wdw = wdw_ref[...]                              # (C, 25)

    # flat spatial index -> (row, col) for the conv boundary masks
    idx = lax.broadcasted_iota(jnp.int32, (1, HW), 1)
    if (W & (W - 1)) == 0:                          # power of two: pure VPU bit ops
        col = jnp.bitwise_and(idx, W - 1)
        row = jnp.right_shift(idx, W.bit_length() - 1)
    else:                                           # generic fallback (untested path)
        col = idx % W
        row = idx // W
    row_ok = [jnp.logical_and(row + (kh - PAD) >= 0, row + (kh - PAD) < H)
              for kh in range(KH)]
    col_ok = [jnp.logical_and(col + (kw - PAD) >= 0, col + (kw - PAD) < W)
              for kw in range(KW)]

    # depthwise 5x5: 25 taps = lane-roll (XLU) + mask + per-channel broadcast-MAC (VPU).
    # Rolls never corrupt valid outputs: any wrapped element is masked to zero,
    # which matches the zero padding of the original conv (padding=2).
    acc = jnp.zeros((C, HW), jnp.float32)
    for kh in range(KH):
        dh = kh - PAD
        for kw in range(KW):
            dw = kw - PAD
            s = dh * W + dw                          # flat shift of this tap
            shifted = xf if s == 0 else pltpu.roll(xf, shift=(-s) % HW, axis=1)
            if dh == 0 and dw == 0:
                contrib = shifted                    # center tap: always valid
            else:
                contrib = jnp.where(jnp.logical_and(row_ok[kh], col_ok[kw]),
                                    shifted, 0.0)
            t = kh * KW + kw
            acc = acc + wdw[:, t:t + 1] * contrib

    # BN1 bias (scale already folded into wdw) + ReLU
    y = jnp.maximum(acc + b1_ref[...], 0.0)          # (C, HW)

    # pointwise 1x1 conv on the VPU: out = sum_c outer(wpw[:, c], y[c, :])
    wpw = wpw_ref[...]                               # (Cout, C)
    out = jnp.zeros((Cout, HW), jnp.float32)
    for c in range(C):
        out = out + wpw[:, c:c + 1] * y[c:c + 1, :]

    # BN2 bias (scale already folded into wpw); lane-dense store (last dim = HW)
    out_ref[0] = (out + b2_ref[...]).astype(out_ref.dtype)


def head_forward(x_nchw, w_dw, g1, b1, m1, v1, w_pw, g2, b2, m2, v2):
    """x_nchw: (N, C, H, W) float32; torch-layout params:
       w_dw (C,1,5,5), w_pw (Cout,C,1,1), BN params (C,)/(Cout,)."""
    N, C, H, W = x_nchw.shape
    Cout = w_pw.shape[0]
    HW = H * W

    # fold eval-mode BN into the conv weights / biases (O(C*25), O(C*Cout) host-side)
    s1 = g1 / jnp.sqrt(v1 + EPS)
    s2 = g2 / jnp.sqrt(v2 + EPS)
    wdw = (w_dw[:, 0, :, :] * s1[:, None, None]).reshape(C, KH * KW)   # (C, 25)
    bb1 = (b1 - m1 * s1).reshape(C, 1)
    wpw = w_pw[:, :, 0, 0] * s2[:, None]                               # (Cout, C)
    bb2 = (b2 - m2 * s2).reshape(Cout, 1)

    x_flat = x_nchw.reshape(N, C, HW)      # free bitcast: NCHW is already channel-major

    kernel = functools.partial(_head_kernel, H=H, W=W)
    out_flat = pl.pallas_call(
        kernel,
        out_shape=jax.ShapeDtypeStruct((N, Cout, HW), jnp.float32),
        grid_spec=pltpu.PrefetchScalarGridSpec(
            num_scalar_prefetch=0,
            grid=(N,),
            in_specs=[
                pl.BlockSpec((1, C, HW), lambda n: (n, 0, 0)),
                pl.BlockSpec((C, KH * KW), lambda n: (0, 0)),
                pl.BlockSpec((C, 1), lambda n: (0, 0)),
                pl.BlockSpec((Cout, C), lambda n: (0, 0)),
                pl.BlockSpec((Cout, 1), lambda n: (0, 0)),
            ],
            out_specs=pl.BlockSpec((1, Cout, HW), lambda n: (n, 0, 0)),
        ),
        compiler_params=pltpu.CompilerParams(
            dimension_semantics=("parallel",)),      # v7x: batch across both TCs
    )(x_flat, wdw, bb1, wpw, bb2)

    return out_flat.reshape(N, Cout, H, W)           # free bitcast back to NCHW


def head_ref(x_nchw, w_dw, g1, b1, m1, v1, w_pw, g2, b2, m2, v2):
    """Pure-JAX reference (lax.conv) mirroring the PyTorch module in eval mode."""
    C = x_nchw.shape[1]
    y = lax.conv_general_dilated(
        x_nchw, w_dw, window_strides=(1, 1), padding=((PAD, PAD), (PAD, PAD)),
        feature_group_count=C, dimension_numbers=("NCHW", "OIHW", "NCHW"))
    y = (y - m1[None, :, None, None]) / jnp.sqrt(v1 + EPS)[None, :, None, None] \
        * g1[None, :, None, None] + b1[None, :, None, None]
    y = jnp.maximum(y, 0.0)
    y = lax.conv_general_dilated(
        y, w_pw, window_strides=(1, 1), padding=((0, 0), (0, 0)),
        dimension_numbers=("NCHW", "OIHW", "NCHW"))
    y = (y - m2[None, :, None, None]) / jnp.sqrt(v2 + EPS)[None, :, None, None] \
        * g2[None, :, None, None] + b2[None, :, None, None]
    return y


if __name__ == "__main__":
    N, C, H, W = 2, 4, 16, 16
    Cout = 8

    key = jax.random.PRNGKey(0)
    ks = jax.random.split(key, 12)

    x = jax.random.normal(ks[0], (N, C, H, W), jnp.float32)

    # deterministic synthetic parameters (torch layouts)
    w_dw = 0.2 * jax.random.normal(ks[1], (C, 1, KH, KW), jnp.float32)
    g1 = 1.0 + 0.1 * jax.random.normal(ks[2], (C,), jnp.float32)
    b1 = 0.1 * jax.random.normal(ks[3], (C,), jnp.float32)
    m1 = 0.1 * jax.random.normal(ks[4], (C,), jnp.float32)
    v1 = jax.random.uniform(ks[5], (C,), jnp.float32, 0.5, 1.5)
    w_pw = 0.2 * jax.random.normal(ks[6], (Cout, C, 1, 1), jnp.float32)
    g2 = 1.0 + 0.1 * jax.random.normal(ks[7], (Cout,), jnp.float32)
    b2 = 0.1 * jax.random.normal(ks[8], (Cout,), jnp.float32)
    m2 = 0.1 * jax.random.normal(ks[9], (Cout,), jnp.float32)
    v2 = jax.random.uniform(ks[10], (Cout,), jnp.float32, 0.5, 1.5)

    out = head_forward(x, w_dw, g1, b1, m1, v1, w_pw, g2, b2, m2, v2)
    out = jax.block_until_ready(out)

    ref = head_ref(x, w_dw, g1, b1, m1, v1, w_pw, g2, b2, m2, v2)
    ref = jax.block_until_ready(ref)

    assert out.shape == (N, Cout, H, W), out.shape
    assert jnp.allclose(out, ref, atol=1e-4, rtol=1e-4), \
        float(jnp.max(jnp.abs(out - ref)))

    print("KERNEL_OK")
</pallas_src>

<mosaic_0001>
module attributes {stable_mosaic.version = 11 : i64} {
  func.func @_head_kernel(%arg0: i32, %arg1: memref<1x4x256xf32, #tpu.memory_space<vmem>>, %arg2: memref<4x25xf32, #tpu.memory_space<vmem>>, %arg3: memref<4x1xf32, #tpu.memory_space<vmem>>, %arg4: memref<8x4xf32, #tpu.memory_space<vmem>>, %arg5: memref<8x1xf32, #tpu.memory_space<vmem>>, %arg6: memref<1x8x256xf32, #tpu.memory_space<vmem>>) attributes {dimension_semantics = [#tpu.dimension_semantics<parallel>], iteration_bounds = array<i64: 2>, scalar_prefetch = 0 : i64, scratch_operands = 0 : i64, tpu.core_type = #tpu.core_type<tc>, window_params = [{transform_indices = @transform_0, window_bounds = array<i64: 1, 4, 256>}, {pipeline_mode = #tpu.pipeline_mode<synchronous>, transform_indices = @transform_1, window_bounds = array<i64: 4, 25>}, {pipeline_mode = #tpu.pipeline_mode<synchronous>, transform_indices = @transform_2, window_bounds = array<i64: 4, 1>}, {pipeline_mode = #tpu.pipeline_mode<synchronous>, transform_indices = @transform_3, window_bounds = array<i64: 8, 4>}, {pipeline_mode = #tpu.pipeline_mode<synchronous>, transform_indices = @transform_4, window_bounds = array<i64: 8, 1>}, {transform_indices = @transform_5, window_bounds = array<i64: 1, 8, 256>}]} {
    %c0 = arith.constant 0 : index
    %c0_0 = arith.constant 0 : index
    %c0_1 = arith.constant 0 : index
    %0 = vector.load %arg1[%c0, %c0_0, %c0_1] : memref<1x4x256xf32, #tpu.memory_space<vmem>>, vector<1x4x256xf32>
    %1 = vector.shape_cast %0 : vector<1x4x256xf32> to vector<4x256xf32>
    %c0_2 = arith.constant 0 : index
    %c0_3 = arith.constant 0 : index
    %2 = vector.load %arg2[%c0_2, %c0_3] : memref<4x25xf32, #tpu.memory_space<vmem>>, vector<4x25xf32>
    %3 = tpu.iota {dimensions = array<i32: 1>} : vector<1x256xi32>
    %c15_i32 = arith.constant 15 : i32
    %4 = vector.broadcast %c15_i32 : i32 to vector<1x256xi32>
    %5 = arith.andi %3, %4 : vector<1x256xi32>
    %c4_i32 = arith.constant 4 : i32
    %6 = vector.broadcast %c4_i32 : i32 to vector<1x256xi32>
    %7 = arith.shrsi %3, %6 : vector<1x256xi32>
    %c-2_i32 = arith.constant -2 : i32
    %8 = vector.broadcast %c-2_i32 : i32 to vector<1x256xi32>
    %9 = arith.addi %7, %8 : vector<1x256xi32>
    %c0_i32 = arith.constant 0 : i32
    %10 = vector.broadcast %c0_i32 : i32 to vector<1x256xi32>
    %11 = arith.cmpi sge, %9, %10 : vector<1x256xi32>
    %c-2_i32_4 = arith.constant -2 : i32
    %12 = vector.broadcast %c-2_i32_4 : i32 to vector<1x256xi32>
    %13 = arith.addi %7, %12 : vector<1x256xi32>
    %c16_i32 = arith.constant 16 : i32
    %14 = vector.broadcast %c16_i32 : i32 to vector<1x256xi32>
    %15 = arith.cmpi slt, %13, %14 : vector<1x256xi32>
    %16 = arith.andi %11, %15 : vector<1x256xi1>
    %c-1_i32 = arith.constant -1 : i32
    %17 = vector.broadcast %c-1_i32 : i32 to vector<1x256xi32>
    %18 = arith.addi %7, %17 : vector<1x256xi32>
    %c0_i32_5 = arith.constant 0 : i32
    %19 = vector.broadcast %c0_i32_5 : i32 to vector<1x256xi32>
    %20 = arith.cmpi sge, %18, %19 : vector<1x256xi32>
    %c-1_i32_6 = arith.constant -1 : i32
    %21 = vector.broadcast %c-1_i32_6 : i32 to vector<1x256xi32>
    %22 = arith.addi %7, %21 : vector<1x256xi32>
    %c16_i32_7 = arith.constant 16 : i32
    %23 = vector.broadcast %c16_i32_7 : i32 to vector<1x256xi32>
    %24 = arith.cmpi slt, %22, %23 : vector<1x256xi32>
    %25 = arith.andi %20, %24 : vector<1x256xi1>
    %c0_i32_8 = arith.constant 0 : i32
    %26 = vector.broadcast %c0_i32_8 : i32 to vector<1x256xi32>
    %27 = arith.addi %7, %26 : vector<1x256xi32>
    %c0_i32_9 = arith.constant 0 : i32
    %28 = vector.broadcast %c0_i32_9 : i32 to vector<1x256xi32>
    %29 = arith.cmpi sge, %27, %28 : vector<1x256xi32>
    %c0_i32_10 = arith.constant 0 : i32
    %30 = vector.broadcast %c0_i32_10 : i32 to vector<1x256xi32>
    %31 = arith.addi %7, %30 : vector<1x256xi32>
    %c16_i32_11 = arith.constant 16 : i32
    %32 = vector.broadcast %c16_i32_11 : i32 to vector<1x256xi32>
    %33 = arith.cmpi slt, %31, %32 : vector<1x256xi32>
    %34 = arith.andi %29, %33 : vector<1x256xi1>
    %c1_i32 = arith.constant 1 : i32
    %35 = vector.broadcast %c1_i32 : i32 to vector<1x256xi32>
    %36 = arith.addi %7, %35 : vector<1x256xi32>
    %c0_i32_12 = arith.constant 0 : i32
    %37 = vector.broadcast %c0_i32_12 : i32 to vector<1x256xi32>
    %38 = arith.cmpi sge, %36, %37 : vector<1x256xi32>
    %c1_i32_13 = arith.constant 1 : i32
    %39 = vector.broadcast %c1_i32_13 : i32 to vector<1x256xi32>
    %40 = arith.addi %7, %39 : vector<1x256xi32>
    %c16_i32_14 = arith.constant 16 : i32
    %41 = vector.broadcast %c16_i32_14 : i32 to vector<1x256xi32>
    %42 = arith.cmpi slt, %40, %41 : vector<1x256xi32>
    %43 = arith.andi %38, %42 : vector<1x256xi1>
    %c2_i32 = arith.constant 2 : i32
    %44 = vector.broadcast %c2_i32 : i32 to vector<1x256xi32>
    %45 = arith.addi %7, %44 : vector<1x256xi32>
    %c0_i32_15 = arith.constant 0 : i32
    %46 = vector.broadcast %c0_i32_15 : i32 to vector<1x256xi32>
    %47 = arith.cmpi sge, %45, %46 : vector<1x256xi32>
    %c2_i32_16 = arith.constant 2 : i32
    %48 = vector.broadcast %c2_i32_16 : i32 to vector<1x256xi32>
    %49 = arith.addi %7, %48 : vector<1x256xi32>
    %c16_i32_17 = arith.constant 16 : i32
    %50 = vector.broadcast %c16_i32_17 : i32 to vector<1x256xi32>
    %51 = arith.cmpi slt, %49, %50 : vector<1x256xi32>
    %52 = arith.andi %47, %51 : vector<1x256xi1>
    %c-2_i32_18 = arith.constant -2 : i32
    %53 = vector.broadcast %c-2_i32_18 : i32 to vector<1x256xi32>
    %54 = arith.addi %5, %53 : vector<1x256xi32>
    %c0_i32_19 = arith.constant 0 : i32
    %55 = vector.broadcast %c0_i32_19 : i32 to vector<1x256xi32>
    %56 = arith.cmpi sge, %54, %55 : vector<1x256xi32>
    %c-2_i32_20 = arith.constant -2 : i32
    %57 = vector.broadcast %c-2_i32_20 : i32 to vector<1x256xi32>
    %58 = arith.addi %5, %57 : vector<1x256xi32>
    %c16_i32_21 = arith.constant 16 : i32
    %59 = vector.broadcast %c16_i32_21 : i32 to vector<1x256xi32>
    %60 = arith.cmpi slt, %58, %59 : vector<1x256xi32>
    %61 = arith.andi %56, %60 : vector<1x256xi1>
    %c-1_i32_22 = arith.constant -1 : i32
    %62 = vector.broadcast %c-1_i32_22 : i32 to vector<1x256xi32>
    %63 = arith.addi %5, %62 : vector<1x256xi32>
    %c0_i32_23 = arith.constant 0 : i32
    %64 = vector.broadcast %c0_i32_23 : i32 to vector<1x256xi32>
    %65 = arith.cmpi sge, %63, %64 : vector<1x256xi32>
    %c-1_i32_24 = arith.constant -1 : i32
    %66 = vector.broadcast %c-1_i32_24 : i32 to vector<1x256xi32>
    %67 = arith.addi %5, %66 : vector<1x256xi32>
    %c16_i32_25 = arith.constant 16 : i32
    %68 = vector.broadcast %c16_i32_25 : i32 to vector<1x256xi32>
    %69 = arith.cmpi slt, %67, %68 : vector<1x256xi32>
    %70 = arith.andi %65, %69 : vector<1x256xi1>
    %c0_i32_26 = arith.constant 0 : i32
    %71 = vector.broadcast %c0_i32_26 : i32 to vector<1x256xi32>
    %72 = arith.addi %5, %71 : vector<1x256xi32>
    %c0_i32_27 = arith.constant 0 : i32
    %73 = vector.broadcast %c0_i32_27 : i32 to vector<1x256xi32>
    %74 = arith.cmpi sge, %72, %73 : vector<1x256xi32>
    %c0_i32_28 = arith.constant 0 : i32
    %75 = vector.broadcast %c0_i32_28 : i32 to vector<1x256xi32>
    %76 = arith.addi %5, %75 : vector<1x256xi32>
    %c16_i32_29 = arith.constant 16 : i32
    %77 = vector.broadcast %c16_i32_29 : i32 to vector<1x256xi32>
    %78 = arith.cmpi slt, %76, %77 : vector<1x256xi32>
    %79 = arith.andi %74, %78 : vector<1x256xi1>
    %c1_i32_30 = arith.constant 1 : i32
    %80 = vector.broadcast %c1_i32_30 : i32 to vector<1x256xi32>
    %81 = arith.addi %5, %80 : vector<1x256xi32>
    %c0_i32_31 = arith.constant 0 : i32
    %82 = vector.broadcast %c0_i32_31 : i32 to vector<1x256xi32>
    %83 = arith.cmpi sge, %81, %82 : vector<1x256xi32>
    %c1_i32_32 = arith.constant 1 : i32
    %84 = vector.broadcast %c1_i32_32 : i32 to vector<1x256xi32>
    %85 = arith.addi %5, %84 : vector<1x256xi32>
    %c16_i32_33 = arith.constant 16 : i32
    %86 = vector.broadcast %c16_i32_33 : i32 to vector<1x256xi32>
    %87 = arith.cmpi slt, %85, %86 : vector<1x256xi32>
    %88 = arith.andi %83, %87 : vector<1x256xi1>
    %c2_i32_34 = arith.constant 2 : i32
    %89 = vector.broadcast %c2_i32_34 : i32 to vector<1x256xi32>
    %90 = arith.addi %5, %89 : vector<1x256xi32>
    %c0_i32_35 = arith.constant 0 : i32
    %91 = vector.broadcast %c0_i32_35 : i32 to vector<1x256xi32>
    %92 = arith.cmpi sge, %90, %91 : vector<1x256xi32>
    %c2_i32_36 = arith.constant 2 : i32
    %93 = vector.broadcast %c2_i32_36 : i32 to vector<1x256xi32>
    %94 = arith.addi %5, %93 : vector<1x256xi32>
    %c16_i32_37 = arith.constant 16 : i32
    %95 = vector.broadcast %c16_i32_37 : i32 to vector<1x256xi32>
    %96 = arith.cmpi slt, %94, %95 : vector<1x256xi32>
    %97 = arith.andi %92, %96 : vector<1x256xi1>
    %cst = arith.constant 0.000000e+00 : f32
    %98 = vector.broadcast %cst : f32 to vector<4x256xf32>
    %c34_i32 = arith.constant 34 : i32
    %99 = tpu.dynamic_rotate %1 by %c34_i32 dim 1 : vector<4x256xf32>, i32 -> vector<4x256xf32>
    %100 = arith.andi %16, %61 : vector<1x256xi1>
    %cst_38 = arith.constant 0.000000e+00 : f32
    %101 = vector.shape_cast %100 : vector<1x256xi1> to vector<1x256xi1>
    %102 = vector.broadcast %101 : vector<1x256xi1> to vector<4x256xi1>
    %103 = vector.broadcast %cst_38 : f32 to vector<4x256xf32>
    %104 = arith.select %102, %99, %103 : vector<4x256xi1>, vector<4x256xf32>
    %105 = vector.extract_strided_slice %2 {offsets = [0, 0], sizes = [4, 1], strides = [1, 1]} : vector<4x25xf32> to vector<4x1xf32>
    %106 = vector.broadcast %105 : vector<4x1xf32> to vector<4x256xf32>
    %107 = arith.mulf %106, %104 : vector<4x256xf32>
    %108 = arith.addf %98, %107 : vector<4x256xf32>
    %c33_i32 = arith.constant 33 : i32
    %109 = tpu.dynamic_rotate %1 by %c33_i32 dim 1 : vector<4x256xf32>, i32 -> vector<4x256xf32>
    %110 = arith.andi %16, %70 : vector<1x256xi1>
    %cst_39 = arith.constant 0.000000e+00 : f32
    %111 = vector.shape_cast %110 : vector<1x256xi1> to vector<1x256xi1>
    %112 = vector.broadcast %111 : vector<1x256xi1> to vector<4x256xi1>
    %113 = vector.broadcast %cst_39 : f32 to vector<4x256xf32>
    %114 = arith.select %112, %109, %113 : vector<4x256xi1>, vector<4x256xf32>
    %115 = vector.extract_strided_slice %2 {offsets = [0, 1], sizes = [4, 1], strides = [1, 1]} : vector<4x25xf32> to vector<4x1xf32>
    %116 = vector.broadcast %115 : vector<4x1xf32> to vector<4x256xf32>
    %117 = arith.mulf %116, %114 : vector<4x256xf32>
    %118 = arith.addf %108, %117 : vector<4x256xf32>
    %c32_i32 = arith.constant 32 : i32
    %119 = tpu.dynamic_rotate %1 by %c32_i32 dim 1 : vector<4x256xf32>, i32 -> vector<4x256xf32>
    %120 = arith.andi %16, %79 : vector<1x256xi1>
    %cst_40 = arith.constant 0.000000e+00 : f32
    %121 = vector.shape_cast %120 : vector<1x256xi1> to vector<1x256xi1>
    %122 = vector.broadcast %121 : vector<1x256xi1> to vector<4x256xi1>
    %123 = vector.broadcast %cst_40 : f32 to vector<4x256xf32>
    %124 = arith.select %122, %119, %123 : vector<4x256xi1>, vector<4x256xf32>
    %125 = vector.extract_strided_slice %2 {offsets = [0, 2], sizes = [4, 1], strides = [1, 1]} : vector<4x25xf32> to vector<4x1xf32>
    %126 = vector.broadcast %125 : vector<4x1xf32> to vector<4x256xf32>
    %127 = arith.mulf %126, %124 : vector<4x256xf32>
    %128 = arith.addf %118, %127 : vector<4x256xf32>
    %c31_i32 = arith.constant 31 : i32
    %129 = tpu.dynamic_rotate %1 by %c31_i32 dim 1 : vector<4x256xf32>, i32 -> vector<4x256xf32>
    %130 = arith.andi %16, %88 : vector<1x256xi1>
    %cst_41 = arith.constant 0.000000e+00 : f32
    %131 = vector.shape_cast %130 : vector<1x256xi1> to vector<1x256xi1>
    %132 = vector.broadcast %131 : vector<1x256xi1> to vector<4x256xi1>
    %133 = vector.broadcast %cst_41 : f32 to vector<4x256xf32>
    %134 = arith.select %132, %129, %133 : vector<4x256xi1>, vector<4x256xf32>
    %135 = vector.extract_strided_slice %2 {offsets = [0, 3], sizes = [4, 1], strides = [1, 1]} : vector<4x25xf32> to vector<4x1xf32>
    %136 = vector.broadcast %135 : vector<4x1xf32> to vector<4x256xf32>
    %137 = arith.mulf %136, %134 : vector<4x256xf32>
    %138 = arith.addf %128, %137 : vector<4x256xf32>
    %c30_i32 = arith.constant 30 : i32
    %139 = tpu.dynamic_rotate %1 by %c30_i32 dim 1 : vector<4x256xf32>, i32 -> vector<4x256xf32>
    %140 = arith.andi %16, %97 : vector<1x256xi1>
    %cst_42 = arith.constant 0.000000e+00 : f32
    %141 = vector.shape_cast %140 : vector<1x256xi1> to vector<1x256xi1>
    %142 = vector.broadcast %141 : vector<1x256xi1> to vector<4x256xi1>
    %143 = vector.broadcast %cst_42 : f32 to vector<4x256xf32>
    %144 = arith.select %142, %139, %143 : vector<4x256xi1>, vector<4x256xf32>
    %145 = vector.extract_strided_slice %2 {offsets = [0, 4], sizes = [4, 1], strides = [1, 1]} : vector<4x25xf32> to vector<4x1xf32>
    %146 = vector.broadcast %145 : vector<4x1xf32> to vector<4x256xf32>
    %147 = arith.mulf %146, %144 : vector<4x256xf32>
    %148 = arith.addf %138, %147 : vector<4x256xf32>
    %c18_i32 = arith.constant 18 : i32
    %149 = tpu.dynamic_rotate %1 by %c18_i32 dim 1 : vector<4x256xf32>, i32 -> vector<4x256xf32>
    %150 = arith.andi %25, %61 : vector<1x256xi1>
    %cst_43 = arith.constant 0.000000e+00 : f32
    %151 = vector.shape_cast %150 : vector<1x256xi1> to vector<1x256xi1>
    %152 = vector.broadcast %151 : vector<1x256xi1> to vector<4x256xi1>
    %153 = vector.broadcast %cst_43 : f32 to vector<4x256xf32>
    %154 = arith.select %152, %149, %153 : vector<4x256xi1>, vector<4x256xf32>
    %155 = vector.extract_strided_slice %2 {offsets = [0, 5], sizes = [4, 1], strides = [1, 1]} : vector<4x25xf32> to vector<4x1xf32>
    %156 = vector.broadcast %155 : vector<4x1xf32> to vector<4x256xf32>
    %157 = arith.mulf %156, %154 : vector<4x256xf32>
    %158 = arith.addf %148, %157 : vector<4x256xf32>
    %c17_i32 = arith.constant 17 : i32
    %159 = tpu.dynamic_rotate %1 by %c17_i32 dim 1 : vector<4x256xf32>, i32 -> vector<4x256xf32>
    %160 = arith.andi %25, %70 : vector<1x256xi1>
    %cst_44 = arith.constant 0.000000e+00 : f32
    %161 = vector.shape_cast %160 : vector<1x256xi1> to vector<1x256xi1>
    %162 = vector.broadcast %161 : vector<1x256xi1> to vector<4x256xi1>
    %163 = vector.broadcast %cst_44 : f32 to vector<4x256xf32>
    %164 = arith.select %162, %159, %163 : vector<4x256xi1>, vector<4x256xf32>
    %165 = vector.extract_strided_slice %2 {offsets = [0, 6], sizes = [4, 1], strides = [1, 1]} : vector<4x25xf32> to vector<4x1xf32>
    %166 = vector.broadcast %165 : vector<4x1xf32> to vector<4x256xf32>
    %167 = arith.mulf %166, %164 : vector<4x256xf32>
    %168 = arith.addf %158, %167 : vector<4x256xf32>
    %c16_i32_45 = arith.constant 16 : i32
    %169 = tpu.dynamic_rotate %1 by %c16_i32_45 dim 1 : vector<4x256xf32>, i32 -> vector<4x256xf32>
    %170 = arith.andi %25, %79 : vector<1x256xi1>
    %cst_46 = arith.constant 0.000000e+00 : f32
    %171 = vector.shape_cast %170 : vector<1x256xi1> to vector<1x256xi1>
    %172 = vector.broadcast %171 : vector<1x256xi1> to vector<4x256xi1>
    %173 = vector.broadcast %cst_46 : f32 to vector<4x256xf32>
    %174 = arith.select %172, %169, %173 : vector<4x256xi1>, vector<4x256xf32>
    %175 = vector.extract_strided_slice %2 {offsets = [0, 7], sizes = [4, 1], strides = [1, 1]} : vector<4x25xf32> to vector<4x1xf32>
    %176 = vector.broadcast %175 : vector<4x1xf32> to vector<4x256xf32>
    %177 = arith.mulf %176, %174 : vector<4x256xf32>
    %178 = arith.addf %168, %177 : vector<4x256xf32>
    %c15_i32_47 = arith.constant 15 : i32
    %179 = tpu.dynamic_rotate %1 by %c15_i32_47 dim 1 : vector<4x256xf32>, i32 -> vector<4x256xf32>
    %180 = arith.andi %25, %88 : vector<1x256xi1>
    %cst_48 = arith.constant 0.000000e+00 : f32
    %181 = vector.shape_cast %180 : vector<1x256xi1> to vector<1x256xi1>
    %182 = vector.broadcast %181 : vector<1x256xi1> to vector<4x256xi1>
    %183 = vector.broadcast %cst_48 : f32 to vector<4x256xf32>
    %184 = arith.select %182, %179, %183 : vector<4x256xi1>, vector<4x256xf32>
    %185 = vector.extract_strided_slice %2 {offsets = [0, 8], sizes = [4, 1], strides = [1, 1]} : vector<4x25xf32> to vector<4x1xf32>
    %186 = vector.broadcast %185 : vector<4x1xf32> to vector<4x256xf32>
    %187 = arith.mulf %186, %184 : vector<4x256xf32>
    %188 = arith.addf %178, %187 : vector<4x256xf32>
    %c14_i32 = arith.constant 14 : i32
    %189 = tpu.dynamic_rotate %1 by %c14_i32 dim 1 : vector<4x256xf32>, i32 -> vector<4x256xf32>
    %190 = arith.andi %25, %97 : vector<1x256xi1>
    %cst_49 = arith.constant 0.000000e+00 : f32
    %191 = vector.shape_cast %190 : vector<1x256xi1> to vector<1x256xi1>
    %192 = vector.broadcast %191 : vector<1x256xi1> to vector<4x256xi1>
    %193 = vector.broadcast %cst_49 : f32 to vector<4x256xf32>
    %194 = arith.select %192, %189, %193 : vector<4x256xi1>, vector<4x256xf32>
    %195 = vector.extract_strided_slice %2 {offsets = [0, 9], sizes = [4, 1], strides = [1, 1]} : vector<4x25xf32> to vector<4x1xf32>
    %196 = vector.broadcast %195 : vector<4x1xf32> to vector<4x256xf32>
    %197 = arith.mulf %196, %194 : vector<4x256xf32>
    %198 = arith.addf %188, %197 : vector<4x256xf32>
    %c2_i32_50 = arith.constant 2 : i32
    %199 = tpu.dynamic_rotate %1 by %c2_i32_50 dim 1 : vector<4x256xf32>, i32 -> vector<4x256xf32>
    %200 = arith.andi %34, %61 : vector<1x256xi1>
    %cst_51 = arith.constant 0.000000e+00 : f32
    %201 = vector.shape_cast %200 : vector<1x256xi1> to vector<1x256xi1>
    %202 = vector.broadcast %201 : vector<1x256xi1> to vector<4x256xi1>
    %203 = vector.broadcast %cst_51 : f32 to vector<4x256xf32>
    %204 = arith.select %202, %199, %203 : vector<4x256xi1>, vector<4x256xf32>
    %205 = vector.extract_strided_slice %2 {offsets = [0, 10], sizes = [4, 1], strides = [1, 1]} : vector<4x25xf32> to vector<4x1xf32>
    %206 = vector.broadcast %205 : vector<4x1xf32> to vector<4x256xf32>
    %207 = arith.mulf %206, %204 : vector<4x256xf32>
    %208 = arith.addf %198, %207 : vector<4x256xf32>
    %c1_i32_52 = arith.constant 1 : i32
    %209 = tpu.dynamic_rotate %1 by %c1_i32_52 dim 1 : vector<4x256xf32>, i32 -> vector<4x256xf32>
    %210 = arith.andi %34, %70 : vector<1x256xi1>
    %cst_53 = arith.constant 0.000000e+00 : f32
    %211 = vector.shape_cast %210 : vector<1x256xi1> to vector<1x256xi1>
    %212 = vector.broadcast %211 : vector<1x256xi1> to vector<4x256xi1>
    %213 = vector.broadcast %cst_53 : f32 to vector<4x256xf32>
    %214 = arith.select %212, %209, %213 : vector<4x256xi1>, vector<4x256xf32>
    %215 = vector.extract_strided_slice %2 {offsets = [0, 11], sizes = [4, 1], strides = [1, 1]} : vector<4x25xf32> to vector<4x1xf32>
    %216 = vector.broadcast %215 : vector<4x1xf32> to vector<4x256xf32>
    %217 = arith.mulf %216, %214 : vector<4x256xf32>
    %218 = arith.addf %208, %217 : vector<4x256xf32>
    %219 = vector.extract_strided_slice %2 {offsets = [0, 12], sizes = [4, 1], strides = [1, 1]} : vector<4x25xf32> to vector<4x1xf32>
    %220 = vector.broadcast %219 : vector<4x1xf32> to vector<4x256xf32>
    %221 = arith.mulf %220, %1 : vector<4x256xf32>
    %222 = arith.addf %218, %221 : vector<4x256xf32>
    %c255_i32 = arith.constant 255 : i32
    %223 = tpu.dynamic_rotate %1 by %c255_i32 dim 1 : vector<4x256xf32>, i32 -> vector<4x256xf32>
    %224 = arith.andi %34, %88 : vector<1x256xi1>
    %cst_54 = arith.constant 0.000000e+00 : f32
    %225 = vector.shape_cast %224 : vector<1x256xi1> to vector<1x256xi1>
    %226 = vector.broadcast %225 : vector<1x256xi1> to vector<4x256xi1>
    %227 = vector.broadcast %cst_54 : f32 to vector<4x256xf32>
    %228 = arith.select %226, %223, %227 : vector<4x256xi1>, vector<4x256xf32>
    %229 = vector.extract_strided_slice %2 {offsets = [0, 13], sizes = [4, 1], strides = [1, 1]} : vector<4x25xf32> to vector<4x1xf32>
    %230 = vector.broadcast %229 : vector<4x1xf32> to vector<4x256xf32>
    %231 = arith.mulf %230, %228 : vector<4x256xf32>
    %232 = arith.addf %222, %231 : vector<4x256xf32>
    %c254_i32 = arith.constant 254 : i32
    %233 = tpu.dynamic_rotate %1 by %c254_i32 dim 1 : vector<4x256xf32>, i32 -> vector<4x256xf32>
    %234 = arith.andi %34, %97 : vector<1x256xi1>
    %cst_55 = arith.constant 0.000000e+00 : f32
    %235 = vector.shape_cast %234 : vector<1x256xi1> to vector<1x256xi1>
    %236 = vector.broadcast %235 : vector<1x256xi1> to vector<4x256xi1>
    %237 = vector.broadcast %cst_55 : f32 to vector<4x256xf32>
    %238 = arith.select %236, %233, %237 : vector<4x256xi1>, vector<4x256xf32>
    %239 = vector.extract_strided_slice %2 {offsets = [0, 14], sizes = [4, 1], strides = [1, 1]} : vector<4x25xf32> to vector<4x1xf32>
    %240 = vector.broadcast %239 : vector<4x1xf32> to vector<4x256xf32>
    %241 = arith.mulf %240, %238 : vector<4x256xf32>
    %242 = arith.addf %232, %241 : vector<4x256xf32>
    %c242_i32 = arith.constant 242 : i32
    %243 = tpu.dynamic_rotate %1 by %c242_i32 dim 1 : vector<4x256xf32>, i32 -> vector<4x256xf32>
    %244 = arith.andi %43, %61 : vector<1x256xi1>
    %cst_56 = arith.constant 0.000000e+00 : f32
    %245 = vector.shape_cast %244 : vector<1x256xi1> to vector<1x256xi1>
    %246 = vector.broadcast %245 : vector<1x256xi1> to vector<4x256xi1>
    %247 = vector.broadcast %cst_56 : f32 to vector<4x256xf32>
    %248 = arith.select %246, %243, %247 : vector<4x256xi1>, vector<4x256xf32>
    %249 = vector.extract_strided_slice %2 {offsets = [0, 15], sizes = [4, 1], strides = [1, 1]} : vector<4x25xf32> to vector<4x1xf32>
    %250 = vector.broadcast %249 : vector<4x1xf32> to vector<4x256xf32>
    %251 = arith.mulf %250, %248 : vector<4x256xf32>
    %252 = arith.addf %242, %251 : vector<4x256xf32>
    %c241_i32 = arith.constant 241 : i32
    %253 = tpu.dynamic_rotate %1 by %c241_i32 dim 1 : vector<4x256xf32>, i32 -> vector<4x256xf32>
    %254 = arith.andi %43, %70 : vector<1x256xi1>
    %cst_57 = arith.constant 0.000000e+00 : f32
    %255 = vector.shape_cast %254 : vector<1x256xi1> to vector<1x256xi1>
    %256 = vector.broadcast %255 : vector<1x256xi1> to vector<4x256xi1>
    %257 = vector.broadcast %cst_57 : f32 to vector<4x256xf32>
    %258 = arith.select %256, %253, %257 : vector<4x256xi1>, vector<4x256xf32>
    %259 = vector.extract_strided_slice %2 {offsets = [0, 16], sizes = [4, 1], strides = [1, 1]} : vector<4x25xf32> to vector<4x1xf32>
    %260 = vector.broadcast %259 : vector<4x1xf32> to vector<4x256xf32>
    %261 = arith.mulf %260, %258 : vector<4x256xf32>
    %262 = arith.addf %252, %261 : vector<4x256xf32>
    %c240_i32 = arith.constant 240 : i32
    %263 = tpu.dynamic_rotate %1 by %c240_i32 dim 1 : vector<4x256xf32>, i32 -> vector<4x256xf32>
    %264 = arith.andi %43, %79 : vector<1x256xi1>
    %cst_58 = arith.constant 0.000000e+00 : f32
    %265 = vector.shape_cast %264 : vector<1x256xi1> to vector<1x256xi1>
    %266 = vector.broadcast %265 : vector<1x256xi1> to vector<4x256xi1>
    %267 = vector.broadcast %cst_58 : f32 to vector<4x256xf32>
    %268 = arith.select %266, %263, %267 : vector<4x256xi1>, vector<4x256xf32>
    %269 = vector.extract_strided_slice %2 {offsets = [0, 17], sizes = [4, 1], strides = [1, 1]} : vector<4x25xf32> to vector<4x1xf32>
    %270 = vector.broadcast %269 : vector<4x1xf32> to vector<4x256xf32>
    %271 = arith.mulf %270, %268 : vector<4x256xf32>
    %272 = arith.addf %262, %271 : vector<4x256xf32>
    %c239_i32 = arith.constant 239 : i32
    %273 = tpu.dynamic_rotate %1 by %c239_i32 dim 1 : vector<4x256xf32>, i32 -> vector<4x256xf32>
    %274 = arith.andi %43, %88 : vector<1x256xi1>
    %cst_59 = arith.constant 0.000000e+00 : f32
    %275 = vector.shape_cast %274 : vector<1x256xi1> to vector<1x256xi1>
    %276 = vector.broadcast %275 : vector<1x256xi1> to vector<4x256xi1>
    %277 = vector.broadcast %cst_59 : f32 to vector<4x256xf32>
    %278 = arith.select %276, %273, %277 : vector<4x256xi1>, vector<4x256xf32>
    %279 = vector.extract_strided_slice %2 {offsets = [0, 18], sizes = [4, 1], strides = [1, 1]} : vector<4x25xf32> to vector<4x1xf32>
    %280 = vector.broadcast %279 : vector<4x1xf32> to vector<4x256xf32>
    %281 = arith.mulf %280, %278 : vector<4x256xf32>
    %282 = arith.addf %272, %281 : vector<4x256xf32>
    %c238_i32 = arith.constant 238 : i32
    %283 = tpu.dynamic_rotate %1 by %c238_i32 dim 1 : vector<4x256xf32>, i32 -> vector<4x256xf32>
    %284 = arith.andi %43, %97 : vector<1x256xi1>
    %cst_60 = arith.constant 0.000000e+00 : f32
    %285 = vector.shape_cast %284 : vector<1x256xi1> to vector<1x256xi1>
    %286 = vector.broadcast %285 : vector<1x256xi1> to vector<4x256xi1>
    %287 = vector.broadcast %cst_60 : f32 to vector<4x256xf32>
    %288 = arith.select %286, %283, %287 : vector<4x256xi1>, vector<4x256xf32>
    %289 = vector.extract_strided_slice %2 {offsets = [0, 19], sizes = [4, 1], strides = [1, 1]} : vector<4x25xf32> to vector<4x1xf32>
    %290 = vector.broadcast %289 : vector<4x1xf32> to vector<4x256xf32>
    %291 = arith.mulf %290, %288 : vector<4x256xf32>
    %292 = arith.addf %282, %291 : vector<4x256xf32>
    %c226_i32 = arith.constant 226 : i32
    %293 = tpu.dynamic_rotate %1 by %c226_i32 dim 1 : vector<4x256xf32>, i32 -> vector<4x256xf32>
    %294 = arith.andi %52, %61 : vector<1x256xi1>
    %cst_61 = arith.constant 0.000000e+00 : f32
    %295 = vector.shape_cast %294 : vector<1x256xi1> to vector<1x256xi1>
    %296 = vector.broadcast %295 : vector<1x256xi1> to vector<4x256xi1>
    %297 = vector.broadcast %cst_61 : f32 to vector<4x256xf32>
    %298 = arith.select %296, %293, %297 : vector<4x256xi1>, vector<4x256xf32>
    %299 = vector.extract_strided_slice %2 {offsets = [0, 20], sizes = [4, 1], strides = [1, 1]} : vector<4x25xf32> to vector<4x1xf32>
    %300 = vector.broadcast %299 : vector<4x1xf32> to vector<4x256xf32>
    %301 = arith.mulf %300, %298 : vector<4x256xf32>
    %302 = arith.addf %292, %301 : vector<4x256xf32>
    %c225_i32 = arith.constant 225 : i32
    %303 = tpu.dynamic_rotate %1 by %c225_i32 dim 1 : vector<4x256xf32>, i32 -> vector<4x256xf32>
    %304 = arith.andi %52, %70 : vector<1x256xi1>
    %cst_62 = arith.constant 0.000000e+00 : f32
    %305 = vector.shape_cast %304 : vector<1x256xi1> to vector<1x256xi1>
    %306 = vector.broadcast %305 : vector<1x256xi1> to vector<4x256xi1>
    %307 = vector.broadcast %cst_62 : f32 to vector<4x256xf32>
    %308 = arith.select %306, %303, %307 : vector<4x256xi1>, vector<4x256xf32>
    %309 = vector.extract_strided_slice %2 {offsets = [0, 21], sizes = [4, 1], strides = [1, 1]} : vector<4x25xf32> to vector<4x1xf32>
    %310 = vector.broadcast %309 : vector<4x1xf32> to vector<4x256xf32>
    %311 = arith.mulf %310, %308 : vector<4x256xf32>
    %312 = arith.addf %302, %311 : vector<4x256xf32>
    %c224_i32 = arith.constant 224 : i32
    %313 = tpu.dynamic_rotate %1 by %c224_i32 dim 1 : vector<4x256xf32>, i32 -> vector<4x256xf32>
    %314 = arith.andi %52, %79 : vector<1x256xi1>
    %cst_63 = arith.constant 0.000000e+00 : f32
    %315 = vector.shape_cast %314 : vector<1x256xi1> to vector<1x256xi1>
    %316 = vector.broadcast %315 : vector<1x256xi1> to vector<4x256xi1>
    %317 = vector.broadcast %cst_63 : f32 to vector<4x256xf32>
    %318 = arith.select %316, %313, %317 : vector<4x256xi1>, vector<4x256xf32>
    %319 = vector.extract_strided_slice %2 {offsets = [0, 22], sizes = [4, 1], strides = [1, 1]} : vector<4x25xf32> to vector<4x1xf32>
    %320 = vector.broadcast %319 : vector<4x1xf32> to vector<4x256xf32>
    %321 = arith.mulf %320, %318 : vector<4x256xf32>
    %322 = arith.addf %312, %321 : vector<4x256xf32>
    %c223_i32 = arith.constant 223 : i32
    %323 = tpu.dynamic_rotate %1 by %c223_i32 dim 1 : vector<4x256xf32>, i32 -> vector<4x256xf32>
    %324 = arith.andi %52, %88 : vector<1x256xi1>
    %cst_64 = arith.constant 0.000000e+00 : f32
    %325 = vector.shape_cast %324 : vector<1x256xi1> to vector<1x256xi1>
    %326 = vector.broadcast %325 : vector<1x256xi1> to vector<4x256xi1>
    %327 = vector.broadcast %cst_64 : f32 to vector<4x256xf32>
    %328 = arith.select %326, %323, %327 : vector<4x256xi1>, vector<4x256xf32>
    %329 = vector.extract_strided_slice %2 {offsets = [0, 23], sizes = [4, 1], strides = [1, 1]} : vector<4x25xf32> to vector<4x1xf32>
    %330 = vector.broadcast %329 : vector<4x1xf32> to vector<4x256xf32>
    %331 = arith.mulf %330, %328 : vector<4x256xf32>
    %332 = arith.addf %322, %331 : vector<4x256xf32>
    %c222_i32 = arith.constant 222 : i32
    %333 = tpu.dynamic_rotate %1 by %c222_i32 dim 1 : vector<4x256xf32>, i32 -> vector<4x256xf32>
    %334 = arith.andi %52, %97 : vector<1x256xi1>
    %cst_65 = arith.constant 0.000000e+00 : f32
    %335 = vector.shape_cast %334 : vector<1x256xi1> to vector<1x256xi1>
    %336 = vector.broadcast %335 : vector<1x256xi1> to vector<4x256xi1>
    %337 = vector.broadcast %cst_65 : f32 to vector<4x256xf32>
    %338 = arith.select %336, %333, %337 : vector<4x256xi1>, vector<4x256xf32>
    %339 = vector.extract_strided_slice %2 {offsets = [0, 24], sizes = [4, 1], strides = [1, 1]} : vector<4x25xf32> to vector<4x1xf32>
    %340 = vector.broadcast %339 : vector<4x1xf32> to vector<4x256xf32>
    %341 = arith.mulf %340, %338 : vector<4x256xf32>
    %342 = arith.addf %332, %341 : vector<4x256xf32>
    %c0_66 = arith.constant 0 : index
    %c0_67 = arith.constant 0 : index
    %343 = vector.load %arg3[%c0_66, %c0_67] : memref<4x1xf32, #tpu.memory_space<vmem>>, vector<4x1xf32>
    %344 = vector.broadcast %343 : vector<4x1xf32> to vector<4x256xf32>
    %345 = arith.addf %342, %344 : vector<4x256xf32>
    %cst_68 = arith.constant 0.000000e+00 : f32
    %346 = vector.broadcast %cst_68 : f32 to vector<4x256xf32>
    %347 = arith.maximumf %345, %346 : vector<4x256xf32>
    %c0_69 = arith.constant 0 : index
    %c0_70 = arith.constant 0 : index
    %348 = vector.load %arg4[%c0_69, %c0_70] : memref<8x4xf32, #tpu.memory_space<vmem>>, vector<8x4xf32>
    %cst_71 = arith.constant 0.000000e+00 : f32
    %349 = vector.broadcast %cst_71 : f32 to vector<8x256xf32>
    %350 = vector.extract_strided_slice %348 {offsets = [0, 0], sizes = [8, 1], strides = [1, 1]} : vector<8x4xf32> to vector<8x1xf32>
    %351 = vector.extract_strided_slice %347 {offsets = [0, 0], sizes = [1, 256], strides = [1, 1]} : vector<4x256xf32> to vector<1x256xf32>
    %352 = vector.broadcast %350 : vector<8x1xf32> to vector<8x256xf32>
    %353 = vector.broadcast %351 : vector<1x256xf32> to vector<8x256xf32>
    %354 = arith.mulf %352, %353 : vector<8x256xf32>
    %355 = arith.addf %349, %354 : vector<8x256xf32>
    %356 = vector.extract_strided_slice %348 {offsets = [0, 1], sizes = [8, 1], strides = [1, 1]} : vector<8x4xf32> to vector<8x1xf32>
    %357 = vector.extract_strided_slice %347 {offsets = [1, 0], sizes = [1, 256], strides = [1, 1]} : vector<4x256xf32> to vector<1x256xf32>
    %358 = vector.broadcast %356 : vector<8x1xf32> to vector<8x256xf32>
    %359 = vector.broadcast %357 : vector<1x256xf32> to vector<8x256xf32>
    %360 = arith.mulf %358, %359 : vector<8x256xf32>
    %361 = arith.addf %355, %360 : vector<8x256xf32>
    %362 = vector.extract_strided_slice %348 {offsets = [0, 2], sizes = [8, 1], strides = [1, 1]} : vector<8x4xf32> to vector<8x1xf32>
    %363 = vector.extract_strided_slice %347 {offsets = [2, 0], sizes = [1, 256], strides = [1, 1]} : vector<4x256xf32> to vector<1x256xf32>
    %364 = vector.broadcast %362 : vector<8x1xf32> to vector<8x256xf32>
    %365 = vector.broadcast %363 : vector<1x256xf32> to vector<8x256xf32>
    %366 = arith.mulf %364, %365 : vector<8x256xf32>
    %367 = arith.addf %361, %366 : vector<8x256xf32>
    %368 = vector.extract_strided_slice %348 {offsets = [0, 3], sizes = [8, 1], strides = [1, 1]} : vector<8x4xf32> to vector<8x1xf32>
    %369 = vector.extract_strided_slice %347 {offsets = [3, 0], sizes = [1, 256], strides = [1, 1]} : vector<4x256xf32> to vector<1x256xf32>
    %370 = vector.broadcast %368 : vector<8x1xf32> to vector<8x256xf32>
    %371 = vector.broadcast %369 : vector<1x256xf32> to vector<8x256xf32>
    %372 = arith.mulf %370, %371 : vector<8x256xf32>
    %373 = arith.addf %367, %372 : vector<8x256xf32>
    %c0_72 = arith.constant 0 : index
    %c0_73 = arith.constant 0 : index
    %374 = vector.load %arg5[%c0_72, %c0_73] : memref<8x1xf32, #tpu.memory_space<vmem>>, vector<8x1xf32>
    %375 = vector.broadcast %374 : vector<8x1xf32> to vector<8x256xf32>
    %376 = arith.addf %373, %375 : vector<8x256xf32>
    %c0_74 = arith.constant 0 : index
    %c0_75 = arith.constant 0 : index
    %c0_76 = arith.constant 0 : index
    %377 = vector.load %arg6[%c0_74, %c0_75, %c0_76] : memref<1x8x256xf32, #tpu.memory_space<vmem>>, vector<1x8x256xf32>
    %378 = vector.shape_cast %377 : vector<1x8x256xf32> to vector<8x256xf32>
    %379 = vector.shape_cast %376 : vector<8x256xf32> to vector<1x8x256xf32>
    tpu.vector_store %arg6[%c0_74, %c0_75, %c0_76], %379 {strides = array<i32>} : memref<1x8x256xf32, #tpu.memory_space<vmem>>, vector<1x8x256xf32>,
    return
  }
  func.func @transform_0(%arg0: i32) -> (i32, i32, i32) {
    %c0_i32 = arith.constant 0 : i32
    %c0_i32_0 = arith.constant 0 : i32
    %c0_i32_1 = arith.constant 0 : i32
    return %arg0, %c0_i32, %c0_i32_0 : i32, i32, i32
  }
  func.func @transform_1(%arg0: i32) -> (i32, i32) {
    %c0_i32 = arith.constant 0 : i32
    %c0_i32_0 = arith.constant 0 : i32
    %c0_i32_1 = arith.constant 0 : i32
    return %c0_i32, %c0_i32_0 : i32, i32
  }
  func.func @transform_2(%arg0: i32) -> (i32, i32) {
    %c0_i32 = arith.constant 0 : i32
    %c0_i32_0 = arith.constant 0 : i32
    %c0_i32_1 = arith.constant 0 : i32
    return %c0_i32, %c0_i32_0 : i32, i32
  }
  func.func @transform_3(%arg0: i32) -> (i32, i32) {
    %c0_i32 = arith.constant 0 : i32
    %c0_i32_0 = arith.constant 0 : i32
    %c0_i32_1 = arith.constant 0 : i32
    return %c0_i32, %c0_i32_0 : i32, i32
  }
  func.func @transform_4(%arg0: i32) -> (i32, i32) {
    %c0_i32 = arith.constant 0 : i32
    %c0_i32_0 = arith.constant 0 : i32
    %c0_i32_1 = arith.constant 0 : i32
    return %c0_i32, %c0_i32_0 : i32, i32
  }
  func.func @transform_5(%arg0: i32) -> (i32, i32, i32) {
    %c0_i32 = arith.constant 0 : i32
    %c0_i32_0 = arith.constant 0 : i32
    %c0_i32_1 = arith.constant 0 : i32
    return %arg0, %c0_i32, %c0_i32_0 : i32, i32, i32
  }
}

</mosaic_0001>

<bundles_post_ra>
// kernel: tpu_custom_call.1
= control target key start
LH: loop header
LB: loop body
LE: loop exit
PB: predicated region body
PF: predicated region fallthrough
CT: control target
= control target key end

     0   :  { %10 = vsyncpa [#allocation3], 0  ;;  %s1950_s0 = inlined_call_operand.vmem [shape: f32[2,4,256], index: 0, kind: input, shape index: {}]   ;;  %s1951_s1 = inlined_call_operand.vmem [shape: f32[4,25], index: 1, kind: input, shape index: {}]   ;;  %s1952_s2 = inlined_call_operand.vmem [shape: f32[4,1], index: 2, kind: input, shape index: {}]   ;;  %s1953_s3 = inlined_call_operand.vmem [shape: f32[8,4], index: 3, kind: input, shape index: {}]   ;;  %s1954_s4 = inlined_call_operand.vmem [shape: f32[8,1], index: 4, kind: input, shape index: {}]   ;;  %s1955_s5 = inlined_call_operand.hbm [shape: f32[2,8,256], index: 5, kind: output, shape index: {}]  }
   0x1   :  { %12 = vsyncpa [#allocation3 + $0x1], 0  ;;  %s1310_s18 = smov 0   ;;  %s1312_s19 = smov 0  }
   0x2   :  { %s1314_s20 = smov 0   ;;  %s1316_s21 = smov 0  }
   0x3 LB: > { %s1331_s22 = sadd.s32 4294967295, %s1228_s21   ;;  %s1032_s23 = sadd.s32 4294967294, %s1228_s21   ;;  %s1228_s21 = sphi %s1316_s21, %s2020_s21   ;;  %s1224_s20 = sphi %s1314_s20, %s2019_s20   ;;  %s1220_s19 = sphi %s1312_s19, %s2018_s19   ;;  %s1216_s18 = sphi %s1310_s18, %s2017_s18  }
   0x4   : > { %s1335_s24 = sadd.s32 1, %s1228_s21   ;;  %s135_s25 = sadd.s32 1, %s1224_s20 }
   0x5   : > { %s132_s26 = ssub.s32 %s1228_s21, %s1335_s24  ;;  %p145_p0 = scmp.ne.s32.totalorder %s1224_s20, %s1220_s19 }
   0x6   : > { %p133_p1 = scmp.eq.s32.totalorder %s132_s26, 0  ;;  %p146_p2 = scmp.eq.s32.totalorder %s1331_s22, 1 }
   0x7   : > { %p151_p3 = scmp.ne.s32.totalorder %s1220_s19, %s1216_s18  ;;  %p152_p4 = scmp.eq.s32.totalorder %s1032_s23, 1 }
   0x8   : > { %s1346_s27 = scalar_select %p133_p1, %s1224_s20, %s135_s25  }
   0x9   : > { %p1348_p5 = por %p146_p2, %p145_p0  ;;  %p1352_p6 = por %p152_p4, %p151_p3 }
   0xa   : > { %p1035_p7 = scmp.ge.s32.totalorder %s1228_s21, 1  ;;  %p190_p8 = scmp.lt.s32.totalorder %s1228_s21, 3 }
   0xc   : > { %p191_p9 = pnand %p1035_p7, %p190_p8 }
   0xd   : > { %v1361_v0 = vld [vmem:[%s1951_s1] sm:$0xf] (!%p191_p9)  ;;  %p218_p10 = scmp.lt.s32.totalorder (!%p191_p9), %s1331_s22, 1  ;;  %v1230_v1 = vmov (!%p191_p9), 0   ;;  %v1231_v2 = vmov (!%p191_p9), 2   ;;  %v1232_v4 = vmov (!%p191_p9), 1   ;;  %v225_v25 = vlaneseq (!%p191_p9) }
   0xe   : > { %194 = sbr.rel (%p191_p9) target bundleno = 371 (0x173), region = 40  ;;  %1134 = vset.pattern.permute.xlu1 (!%p191_p9), %v1230_v1  ;;  %1136 = vset.pattern.permute.xlu0 (!%p191_p9), %v1231_v2  ;;  %s1233_s12 = smov (!%p191_p9), 33   ;;  %v1236_v6 = vmov (!%p191_p9), 12   ;;  %v1239_v7 = vmov (!%p191_p9), 3   ;;  %v1240_v8 = vmov (!%p191_p9), 4   ;;  %v1242_v9 = vmov (!%p191_p9), 5  }
   0xf   : > { %328 = vperm.xlu1 (!%p191_p9), %1134, %v1361_v0   ;;  %s1234_s13 = smov (!%p191_p9), 34   ;;  %s1235_s14 = smov (!%p191_p9), 32   ;;  %v1243_v10 = vmov (!%p191_p9), 6   ;;  %v1245_v11 = vmov (!%p191_p9), 7   ;;  %v1247_v12 = vmov (!%p191_p9), 8   ;;  %v1248_v13 = vmov (!%p191_p9), 9  }
  0x10   : > { %s1237_s15 = smov (!%p191_p9), 31   ;;  %s1238_s16 = smov (!%p191_p9), 30   ;;  %v1250_v14 = vmov (!%p191_p9), 10   ;;  %v1252_v15 = vmov (!%p191_p9), 11   ;;  %v1254_v16 = vmov (!%p191_p9), 14   ;;  %v1258_v17 = vmov (!%p191_p9), 17  }
  0x11   : > { %s1241_s17 = smov (!%p191_p9), 18   ;;  %s1244_s23 = smov (!%p191_p9), 17   ;;  %v1259_v18 = vmov (!%p191_p9), 18   ;;  %v1260_v19 = vmov (!%p191_p9), 19   ;;  %v1261_v20 = vmov (!%p191_p9), 13   ;;  %v1262_v21 = vmov (!%p191_p9), 20  }
  0x12   : > { %s1246_s25 = smov (!%p191_p9), 16   ;;  %s1249_s26 = smov (!%p191_p9), 15   ;;  %v1263_v22 = vmov (!%p191_p9), 15   ;;  %v1264_v23 = vmov (!%p191_p9), 21   ;;  %v1265_v24 = vmov (!%p191_p9), 22   ;;  %v1266_v26 = vmov (!%p191_p9), 16  }
  0x13   : > { %1135 = vset.pattern.permute.xlu1 (!%p191_p9), %v1232_v4  ;;  %s1251_s30 = smov (!%p191_p9), 14   ;;  %s1253_s6 = smov (!%p191_p9), 127   ;;  %v1430_v27 = vand.u32 (!%p191_p9), 127, %v225_v25  ;;  %v1267_v28 = vmov (!%p191_p9), 23   ;;  %v1269_v30 = vmov (!%p191_p9), 24   ;;  %v1467_v43 = vld [vmem:[%s1953_s3] sm:$0xff] (!%p191_p9) }
  0x14   : > { %s1257_s9 = smov (!%p191_p9), 1   ;;  %s1268_s10 = smov (!%p191_p9), 114   ;;  %v872_v36 = vld [vmem:[%s1952_s2] sm:$0xf] (!%p191_p9) }
  0x15   : > { %s219_s7 = scalar_select %p218_p10, %s1331_s22, 1  ;;  %v227_v29 = vadd.s32 128, %v1430_v27  ;;  %v1439_v32 = vshra.s32 %v1430_v27, 4  ;;  %v1447_v34 = vand.u32 15, %v1430_v27  ;;  %vm339_vm6 = vcmp.lt.s32.totalorder %v1430_v27, 33 }
  0x16   : > { %vm315_vm13 = vcmp.lt.s32.totalorder %v1430_v27, 34 }
  0x17   : > { %s1044_s8 = sshll.u32 %s219_s7, 3  ;;  %s1255_s7 = smov 2   ;;  %v1441_v33 = vshra.s32 %v227_v29, 4  ;;  %v232_v35 = vadd.s32 4294967294, %v1439_v32  ;;  %v1454_v37 = vand.u32 15, %v227_v29  ;;  %v1458_v40 = vadd.s32 4294967295, %v1447_v34 }
  0x18   : > { %s222_s11 = scalar_lea.vmem %s1950_s0, %s1044_s8  ;;  %s1256_s8 = smov 126   ;;  %v1483_v48 = vadd.s32 4294967294, %v1447_v34  ;;  %v1519_v62 = vadd.s32 1, %v1447_v34 }
  0x19   : > { %v1371_v3 = vld [vmem:[%s222_s11] sm:$0xff]  ;;  %s1270_s11 = smov 113   ;;  %v233_v38 = vadd.s32 4294967294, %v1441_v33  ;;  %v1462_v41 = vadd.s32 4294967295, %v1454_v37  ;;  %vm234_vm0 = vcmp.ge.s32.totalorder %v232_v35, 0  ;;  %vm236_vm1 = vcmp.lt.s32.totalorder %v232_v35, 16 }
  0x1a   : > { %335 = vrot.lane.b32.xlu1 %v1371_v3, %s1233_s12  ;;  %311 = vrot.lane.b32.xlu0 %v1371_v3, %s1234_s13  ;;  %v1378_v5 = vcombine.high %v1371_v3, %v1371_v3  ;;  %vm1959_vm4 = vcmp.ge.s32.totalorder %v1458_v40, 0  ;;  %vm1470_vm5 = vmand %vm234_vm0, %vm236_vm1  ;;  %v1490_v49 = vadd.s32 4294967294, %v1454_v37  ;;  %vm272_vm11 = vcmp.ge.s32.totalorder %v1483_v48, 0 }
  0x1b   : > { %vm235_vm2 = vcmp.ge.s32.totalorder %v233_v38, 0  ;;  %vm237_vm3 = vcmp.lt.s32.totalorder %v233_v38, 16  ;;  %vm1957_vm7 = vcmp.ge.s32.totalorder %v1462_v41, 0  ;;  %vm342_vm9 = vmand %vm1470_vm5, %vm1959_vm4  ;;  %vm362_vm0 = vcmp.lt.s32.totalorder %v1430_v27, 32 }
  0x1c   : > { %vm1478_vm8 = vmand %vm235_vm2, %vm237_vm3  ;;  %vm273_vm12 = vcmp.ge.s32.totalorder %v1490_v49, 0  ;;  %vm385_vm1 = vcmp.lt.s32.totalorder %v1430_v27, 31  ;;  %vm1958_vm2 = vcmp.lt.s32.totalorder %v1519_v62, 16 }
  0x1d   : > { %vm343_vm10 = vmand %vm1478_vm8, %vm1957_vm7 }
  0x1e   : > { %351 = vperm.xlu1 %1135, %v1361_v0   ;;  %313 = vrot.lane.b32.xlu0 %v1378_v5, %s1234_s13  ;;  %vm1507_vm14 = vmand %vm1470_vm5, %vm272_vm11 }
  0x1f   : > { %vm319_vm15 = vmand %vm1478_vm8, %vm273_vm12 }
  0x22   : > { %360 = vrot.lane.b32.xlu1 %v1378_v5, %s1235_s14  ;;  %337 = vrot.lane.b32.xlu0 %v1378_v5, %s1233_s12  ;;  %s1271_s12 = smov 95  }
  0x23   : > { %1146 = vset.pattern.permute.xlu1 %v1236_v6 }
  0x26   : > { %381 = vrot.lane.b32.xlu1 %v1371_v3, %s1237_s15  ;;  %358 = vrot.lane.b32.xlu0 %v1371_v3, %s1235_s14 }
  0x2a   : > { %383 = vrot.lane.b32.xlu1 %v1378_v5, %s1237_s15  ;;  %374 = vperm.xlu0 %1136, %v1361_v0  }
  0x2e   : > { %404 = vrot.lane.b32.xlu1 %v1371_v3, %s1238_s16  ;;  %1137 = vset.pattern.permute.xlu0 %v1239_v7 }
  0x2f   : > { %397 = vperm.xlu0 %1137, %v1361_v0  }
  0x32   : > { %406 = vrot.lane.b32.xlu1 %v1378_v5, %s1238_s16 }
  0x33   : > { %1138 = vset.pattern.permute.xlu0 %v1240_v8 }
  0x34   : > { %420 = vperm.xlu0 %1138, %v1361_v0  }
  0x36   : > { %427 = vrot.lane.b32.xlu1 %v1371_v3, %s1241_s17 }
  0x38   : > { %1139 = vset.pattern.permute.xlu0 %v1242_v9 }
  0x39   : > { %443 = vperm.xlu0 %1139, %v1361_v0  }
  0x3a   : > { %429 = vrot.lane.b32.xlu1 %v1378_v5, %s1241_s17  ;;  %s1272_s17 = smov 112  }
  0x3d   : > { %1140 = vset.pattern.permute.xlu0 %v1243_v10 }
  0x3e   : > { %450 = vrot.lane.b32.xlu1 %v1371_v3, %s1244_s23  ;;  %466 = vperm.xlu0 %1140, %v1361_v0  }
  0x42   : > { %452 = vrot.lane.b32.xlu1 %v1378_v5, %s1244_s23  ;;  %1141 = vset.pattern.permute.xlu0 %v1245_v11  ;;  %s1273_s23 = smov 111   ;;  %v1531_v11 = vadd.s32 2, %v1447_v34  ;;  %v241_v34 = vadd.s32 4294967295, %v1441_v33 }
  0x43   : > { %489 = vperm.xlu0 %1141, %v1361_v0  }
  0x46   : > { %473 = vrot.lane.b32.xlu1 %v1371_v3, %s1246_s25 }
  0x47   : > { %1142 = vset.pattern.permute.xlu0 %v1247_v12  ;;  %v1534_v12 = vadd.s32 2, %v1454_v37 }
  0x48   : > { %512 = vperm.xlu0 %1142, %v1361_v0  }
  0x4a   : > { %475 = vrot.lane.b32.xlu1 %v1378_v5, %s1246_s25  ;;  %s1274_s25 = smov 110  }
  0x4c   : > { %1143 = vset.pattern.permute.xlu0 %v1248_v13 }
  0x4d   : > { %535 = vperm.xlu0 %1143, %v1361_v0  }
  0x4e   : > { %496 = vrot.lane.b32.xlu1 %v1371_v3, %s1249_s26 }
  0x51   : > { %1144 = vset.pattern.permute.xlu0 %v1250_v14 }
  0x52   : > { %498 = vrot.lane.b32.xlu1 %v1378_v5, %s1249_s26  ;;  %558 = vperm.xlu0 %1144, %v1361_v0   ;;  %s1275_s26 = smov 98  }
  0x56   : > { %519 = vrot.lane.b32.xlu1 %v1371_v3, %s1251_s30  ;;  %1145 = vset.pattern.permute.xlu0 %v1252_v15 }
  0x57   : > { %581 = vperm.xlu0 %1145, %v1361_v0  }
  0x5a   : > { %521 = vrot.lane.b32.xlu1 %v1378_v5, %s1251_s30  ;;  %s1276_s30 = smov 97  }
  0x5b   : > { %598 = vrot.lane.b32.xlu0 %v1378_v5, %s1253_s6 }
  0x5c   : > { %1148 = vset.pattern.permute.xlu0 %v1254_v16 }
  0x5e   : > { %542 = vrot.lane.b32.xlu1 %v1371_v3, %s1255_s7 }
  0x5f   : > { %619 = vrot.lane.b32.xlu0 %v1371_v3, %s1256_s8 }
  0x62   : > { %544 = vrot.lane.b32.xlu1 %v1378_v5, %s1255_s7  ;;  %s1278_s7 = smov 94  }
  0x63   : > { %635 = vperm.xlu0 %1148, %v1361_v0  }
  0x66   : > { %565 = vrot.lane.b32.xlu1 %v1371_v3, %s1257_s9 }
  0x67   : > { %1151 = vset.pattern.permute.xlu0 %v1258_v17 }
  0x68   : > { %704 = vperm.xlu0 %1151, %v1361_v0  }
  0x6a   : > { %567 = vrot.lane.b32.xlu1 %v1378_v5, %s1257_s9 }
  0x6c   : > { %1152 = vset.pattern.permute.xlu0 %v1259_v18 }
  0x6d   : > { %727 = vperm.xlu0 %1152, %v1361_v0  }
  0x6e   : > { %589 = vperm.xlu1 %1146, %v1361_v0  }
  0x71   : > { %1153 = vset.pattern.permute.xlu0 %v1260_v19 }
  0x72   : > { %596 = vrot.lane.b32.xlu1 %v1371_v3, %s1253_s6  ;;  %750 = vperm.xlu0 %1153, %v1361_v0   ;;  %s1277_s6 = smov 96  }
  0x73   : > { %1147 = vset.pattern.permute.xlu1 %v1261_v20 }
  0x76   : > { %612 = vperm.xlu1 %1147, %v1361_v0   ;;  %1154 = vset.pattern.permute.xlu0 %v1262_v21 }
  0x77   : > { %773 = vperm.xlu0 %1154, %v1361_v0  }
  0x7a   : > { %621 = vrot.lane.b32.xlu1 %v1378_v5, %s1256_s8 }
  0x7b   : > { %1149 = vset.pattern.permute.xlu1 %v1263_v22  ;;  %1155 = vset.pattern.permute.xlu0 %v1264_v23 }
  0x7c   : > { %796 = vperm.xlu0 %1155, %v1361_v0  }
  0x7e   : > { %658 = vperm.xlu1 %1149, %v1361_v0  }
  0x80   : > { %1156 = vset.pattern.permute.xlu0 %v1265_v24 }
  0x81   : > { %819 = vperm.xlu0 %1156, %v1361_v0  }
  0x82   : > { %1150 = vset.pattern.permute.xlu1 %v1266_v26 }
  0x83   : > { %681 = vperm.xlu1 %1150, %v1361_v0  }
  0x85   : > { %1157 = vset.pattern.permute.xlu0 %v1267_v28  ;;  %v240_v28 = vadd.s32 4294967295, %v1439_v32 }
  0x86   : > { %842 = vperm.xlu0 %1157, %v1361_v0  }
  0x87   : > { %642 = vrot.lane.b32.xlu1 %v1371_v3, %s1268_s10 }
  0x88   : > { %1160 = vset.pattern.permute.xlu1 %v1232_v4 }
  0x8a   : > { %1158 = vset.pattern.permute.xlu0 %v1269_v30 }
  0x8b   : > { %644 = vrot.lane.b32.xlu1 %v1378_v5, %s1268_s10  ;;  %865 = vperm.xlu0 %1158, %v1361_v0   ;;  %s215_s10 = sand.u32 1, %s1220_s19  }
  0x8c   : > { %v312_v31 = vpop.permute.xlu0 %311 }
  0x8e   : > { %v329_v42 = vpop.permute.xlu1 %328 }
  0x8f   : > { %665 = vrot.lane.b32.xlu1 %v1371_v3, %s1270_s11  ;;  %826 = vrot.lane.b32.xlu0 %v1371_v3, %s1271_s12 }
  0x90   : > { %1159 = vset.pattern.permute.xlu0 %v1230_v1  ;;  %v314_v39 = vpop.permute.xlu0 %313 }
  0x91   : > { %v316_v58 = vsel %vm315_vm13, %v312_v31, %v314_v39  ;;  %v317_v59 = vsel %vm315_vm13, %v314_v39, %v312_v31  ;;  %vm305_vm13 = vcmp.lt.s32.totalorder %v1534_v12, 16 }
  0x92   : > { %v336_v47 = vpop.permute.xlu1 %335  ;;  %v324_v63 = vsel %vm1507_vm14, %v317_v59, 0.0  ;;  %v325_v0 = vsel %vm319_vm15, %v316_v58, 0.0  ;;  %vm408_vm14 = vcmp.lt.s32.totalorder %v1430_v27, 30 }
  0x93   : > { %667 = vrot.lane.b32.xlu1 %v1378_v5, %s1270_s11  ;;  %875 = vperm.xlu0 %1159, %v872_v36   ;;  %v331_v9 = vmul.f32 %v329_v42, %v324_v63  ;;  %v332_v10 = vmul.f32 %v329_v42, %v325_v0  ;;  %s1036_s11 = sshll.u32 %s215_s10, 4 }
  0x94   : > { %v338_v45 = vpop.permute.xlu0 %337  ;;  %s217_s13 = scalar_lea.vmem [#allocation2], %s1036_s11 }
  0x95   : > { %v340_v50 = vsel %vm339_vm6, %v336_v47, %v338_v45  ;;  %v341_v51 = vsel %vm339_vm6, %v338_v45, %v336_v47  ;;  %vm388_vm6 = vmand %vm1470_vm5, %vm1958_vm2  ;;  %s973_s14 = sshll.u32 %s217_s13, 4  ;;  %s1908_s14 = int_to_ptr.vmem [resolvable:$true] %s973_s14 }
  0x96   : > { %v348_v53 = vsel %vm342_vm9, %v341_v51, 0.0  ;;  %v349_v54 = vsel %vm343_vm10, %v340_v50, 0.0  ;;  %vm1960_vm10 = vcmp.lt.s32.totalorder %v1531_v11, 16 }
  0x97   : > { %688 = vrot.lane.b32.xlu1 %v1371_v3, %s1272_s17  ;;  %885 = vperm.xlu0 %1159, %v1467_v43   ;;  %vm411_vm15 = vmand %vm1470_vm5, %vm1960_vm10 }
  0x98   : > { %v359_v61 = vpop.permute.xlu0 %358 }
  0x9b   : > { %690 = vrot.lane.b32.xlu1 %v1378_v5, %s1272_s17  ;;  %1161 = vset.pattern.permute.xlu0 %v1231_v2  ;;  %v1524_v2 = vadd.s32 1, %v1454_v37 }
  0x9c   : > { %917 = vperm.xlu0 %1161, %v1467_v43  }
  0x9d   : > { %v352_v52 = vpop.permute.xlu1 %351  ;;  %vm1956_vm3 = vcmp.lt.s32.totalorder %v1524_v2, 16 }
  0x9e   : > { %v354_v55 = vmul.f32 %v352_v52, %v348_v53  ;;  %v355_v56 = vmul.f32 %v352_v52, %v349_v54  ;;  %vm389_vm9 = vmand %vm1478_vm8, %vm1956_vm3  ;;  %vm245_vm3 = vcmp.lt.s32.totalorder %v241_v34, 16  ;;  %v948_v53 = vld [vmem:[%s1954_s4] sm:$0xff] }
  0x9f   : > { %711 = vrot.lane.b32.xlu1 %v1371_v3, %s1273_s23 }
  0xa0   : > { %1164 = vset.pattern.permute.xlu0 %v1230_v1  ;;  %v356_v13 = vadd.f32 %v354_v55, %v331_v9  ;;  %v357_v14 = vadd.f32 %v355_v56, %v332_v10 }
  0xa1   : > { %v361_v60 = vpop.permute.xlu1 %360 }
  0xa2   : > { %v363_v6 = vsel %vm362_vm0, %v359_v61, %v361_v60  ;;  %v364_v8 = vsel %vm362_vm0, %v361_v60, %v359_v61  ;;  %vm412_vm0 = vmand %vm1478_vm8, %vm305_vm13 }
  0xa3   : > { %713 = vrot.lane.b32.xlu1 %v1378_v5, %s1273_s23  ;;  %v371_v16 = vsel %vm1470_vm5, %v364_v8, 0.0  ;;  %v372_v17 = vsel %vm1478_vm8, %v363_v6, 0.0  ;;  %s1166_s23 = scalar_lea.vmem %s1908_s14, 256 }
  0xa4   : > { %p1167_p11 = scmp.ne.s32.totalorder %s1908_s14, %s1166_s23 }
  0xa5   : > { %v382_v4 = vpop.permute.xlu1 %381 }
  0xa6   : > { %p1168_p12 = pnand %p1167_p11, %p1348_p5 }
  0xa7   : > { %734 = vrot.lane.b32.xlu1 %v1371_v3, %s1274_s25 }
  0xa8   : > { %p1169_p13 = pneg %p1168_p12 }
  0xa9   : > { %v384_v15 = vpop.permute.xlu1 %383  ;;  %v375_v18 = vpop.permute.xlu0 %374 }
  0xaa   : > { %v386_v19 = vsel %vm385_vm1, %v382_v4, %v384_v15  ;;  %v387_v20 = vsel %vm385_vm1, %v384_v15, %v382_v4  ;;  %v377_v21 = vmul.f32 %v375_v18, %v371_v16  ;;  %v378_v22 = vmul.f32 %v375_v18, %v372_v17 }
  0xab   : > { %736 = vrot.lane.b32.xlu1 %v1378_v5, %s1274_s25  ;;  %v394_v29 = vsel %vm388_vm6, %v387_v20, 0.0  ;;  %v395_v30 = vsel %vm389_vm9, %v386_v19, 0.0  ;;  %vm242_vm1 = vcmp.ge.s32.totalorder %v240_v28, 0  ;;  %vm244_vm6 = vcmp.lt.s32.totalorder %v240_v28, 16  ;;  %s1279_s25 = smov [#allocation2]  }
  0xac   : > { %v379_v23 = vadd.f32 %v377_v21, %v356_v13  ;;  %v380_v24 = vadd.f32 %v378_v22, %v357_v14  ;;  %vm243_vm9 = vcmp.ge.s32.totalorder %v241_v34, 0  ;;  %vm1564_vm5 = vmand %vm242_vm1, %vm244_vm6 }
  0xad   : > { %v405_v26 = vpop.permute.xlu1 %404  ;;  %vm1568_vm8 = vmand %vm243_vm9, %vm245_vm3  ;;  %vm477_vm9 = vcmp.lt.s32.totalorder %v1430_v27, 16 }
  0xae   : > { %v398_v31 = vpop.permute.xlu0 %397  ;;  %vm435_vm3 = vmand %vm1568_vm8, %vm273_vm12 }
  0xaf   : > { %v400_v35 = vmul.f32 %v398_v31, %v394_v29  ;;  %v401_v36 = vmul.f32 %v398_v31, %v395_v30  ;;  %757 = vrot.lane.b32.xlu1 %v1371_v3, %s1275_s26  ;;  %vm457_vm1 = vmand %vm1564_vm5, %vm1959_vm4 }
  0xb0   : > { %vm458_vm6 = vmand %vm1568_vm8, %vm1957_vm7 }
  0xb1   : > { %v402_v37 = vadd.f32 %v400_v35, %v379_v23  ;;  %v403_v38 = vadd.f32 %v401_v36, %v380_v24  ;;  %v407_v39 = vpop.permute.xlu1 %406 }
  0xb2   : > { %v409_v42 = vsel %vm408_vm14, %v405_v26, %v407_v39  ;;  %v410_v45 = vsel %vm408_vm14, %v407_v39, %v405_v26  ;;  %vm431_vm14 = vcmp.lt.s32.totalorder %v1430_v27, 18 }
  0xb3   : > { %v417_v47 = vsel %vm411_vm15, %v410_v45, 0.0  ;;  %v418_v50 = vsel %vm412_vm0, %v409_v42, 0.0  ;;  %v421_v51 = vpop.permute.xlu0 %420  ;;  %759 = vrot.lane.b32.xlu1 %v1378_v5, %s1275_s26  ;;  %vm434_vm15 = vmand %vm1564_vm5, %vm272_vm11  ;;  %vm454_vm0 = vcmp.lt.s32.totalorder %v1430_v27, 17  ;;  %s1170_s26 = sshll.u32 %s1279_s25, 4  ;;  %s1171_s26 = int_to_ptr.vmem [resolvable:$false] %s1170_s26 }
  0xb4   : > { %v423_v44 = vmul.f32 %v421_v51, %v417_v47  ;;  %v424_v52 = vmul.f32 %v421_v51, %v418_v50  ;;  %p1173_p0 = scmp.lt.s32.totalorder %s1908_s14, %s1171_s26 }
  0xb5   : > { %v428_v46 = vpop.permute.xlu1 %427 }
  0xb6   : > { %v425_v55 = vadd.f32 %v423_v44, %v402_v37  ;;  %v426_v56 = vadd.f32 %v424_v52, %v403_v38 }
  0xb7   : > { %780 = vrot.lane.b32.xlu1 %v1371_v3, %s1276_s30 }
  0xb8   : > { %v444_v58 = vpop.permute.xlu0 %443 }
  0xb9   : > { %v430_v57 = vpop.permute.xlu1 %429 }
  0xba   : > { %v432_v59 = vsel %vm431_vm14, %v428_v46, %v430_v57  ;;  %v433_v60 = vsel %vm431_vm14, %v430_v57, %v428_v46  ;;  %vm500_vm14 = vcmp.lt.s32.totalorder %v1430_v27, 15 }
  0xbb   : > { %v440_v61 = vsel %vm434_vm15, %v433_v60, 0.0  ;;  %v441_v63 = vsel %vm435_vm3, %v432_v59, 0.0  ;;  %782 = vrot.lane.b32.xlu1 %v1378_v5, %s1276_s30  ;;  %vm503_vm15 = vmand %vm1564_vm5, %vm1958_vm2  ;;  %vm1973_vm3 = vcmp.lt.s32.totalorder %v1524_v2, 16  ;;  %s1172_s30 = scalar_lea.vmem %s1171_s26, 512 }
  0xbc   : > { %v446_v0 = vmul.f32 %v444_v58, %v440_v61  ;;  %v447_v4 = vmul.f32 %v444_v58, %v441_v63  ;;  %v254_v61 = vadd.s32 1, %v1439_v32  ;;  %p1174_p1 = scmp.lt.s32.totalorder %s1172_s30, %s1166_s23 }
  0xbd   : > { %v451_v6 = vpop.permute.xlu1 %450  ;;  %v467_v13 = vpop.permute.xlu0 %466 }
  0xbe   : > { %v448_v8 = vadd.f32 %v446_v0, %v425_v55  ;;  %v449_v9 = vadd.f32 %v447_v4, %v426_v56  ;;  %p1175_p2 = por %p1174_p1, %p1173_p0 }
  0xbf   : > { %803 = vrot.lane.b32.xlu1 %v1371_v3, %s1277_s6 }
  0xc0   : > { %p1176_p3 = pnand %p1175_p2, %p1169_p13 }
  0xc1   : > { %v453_v10 = vpop.permute.xlu1 %452 }
  0xc2   : > { %v455_v14 = vsel %vm454_vm0, %v451_v6, %v453_v10  ;;  %v456_v15 = vsel %vm454_vm0, %v453_v10, %v451_v6  ;;  %v490_v24 = vpop.permute.xlu0 %489  ;;  %vm504_vm0 = vmand %vm1568_vm8, %vm1973_vm3  ;;  %vm251_vm3 = vcmp.lt.s32.totalorder %v1441_v33, 16 }
  0xc3   : > { %v463_v16 = vsel %vm457_vm1, %v456_v15, 0.0  ;;  %v464_v17 = vsel %vm458_vm6, %v455_v14, 0.0  ;;  %805 = vrot.lane.b32.xlu1 %v1378_v5, %s1277_s6  ;;  %vm523_vm1 = vcmp.lt.s32.totalorder %v1430_v27, 14  ;;  %vm526_vm6 = vmand %vm1564_vm5, %vm1960_vm10 }
  0xc4   : > { %v469_v18 = vmul.f32 %v467_v13, %v463_v16  ;;  %v470_v19 = vmul.f32 %v467_v13, %v464_v17 }
  0xc5   : > { %v474_v20 = vpop.permute.xlu1 %473 }
  0xc6   : > { %v471_v21 = vadd.f32 %v469_v18, %v448_v8  ;;  %v472_v22 = vadd.f32 %v470_v19, %v449_v9 }
  0xc7   : > { %828 = vrot.lane.b32.xlu1 %v1378_v5, %s1271_s12  ;;  %v513_v39 = vpop.permute.xlu0 %512  ;;  %s1045_s12 = sshll.u32 %s1331_s22, 8  ;;  %s959_s22 = scalar_lea.sflag [#allocation3], %s215_s10 }
  0xc8   : > { %s1906_s17 = scalar_lea.hbm %s1955_s5, %s1045_s12 }
  0xc9   : > { %v476_v23 = vpop.permute.xlu1 %475 }
  0xca   : > { %v478_v26 = vsel %vm477_vm9, %v474_v20, %v476_v23  ;;  %v479_v28 = vsel %vm477_vm9, %v476_v23, %v474_v20  ;;  %vm527_vm9 = vmand %vm1568_vm8, %vm305_vm13 }
  0xcb   : > { %v486_v29 = vsel %vm1564_vm5, %v479_v28, 0.0  ;;  %v487_v30 = vsel %vm1568_vm8, %v478_v26, 0.0  ;;  %849 = vrot.lane.b32.xlu1 %v1371_v3, %s1278_s7  ;;  %vm249_vm5 = vcmp.ge.s32.totalorder %v1441_v33, 0 }
  0xcc   : > { %v492_v31 = vmul.f32 %v490_v24, %v486_v29  ;;  %v493_v34 = vmul.f32 %v490_v24, %v487_v30  ;;  %v536_v57 = vpop.permute.xlu0 %535 }
  0xcd   : > { %v497_v35 = vpop.permute.xlu1 %496 }
  0xce   : > { %v494_v36 = vadd.f32 %v492_v31, %v471_v21  ;;  %v495_v37 = vadd.f32 %v493_v34, %v472_v22 }
  0xcf   : > { %851 = vrot.lane.b32.xlu1 %v1378_v5, %s1278_s7 }
  0xd1   : > { %v499_v38 = vpop.permute.xlu1 %498  ;;  %v559_v8 = vpop.permute.xlu0 %558 }
  0xd2   : > { %v501_v42 = vsel %vm500_vm14, %v497_v35, %v499_v38  ;;  %v502_v45 = vsel %vm500_vm14, %v499_v38, %v497_v35  ;;  %vm248_vm14 = vcmp.ge.s32.totalorder %v1439_v32, 0 }
  0xd3   : > { %v509_v47 = vsel %vm503_vm15, %v502_v45, 0.0  ;;  %v510_v50 = vsel %vm504_vm0, %v501_v42, 0.0  ;;  %901 = vperm.xlu1 %1160, %v1467_v43   ;;  %vm250_vm15 = vcmp.lt.s32.totalorder %v1439_v32, 16  ;;  %vm1636_vm0 = vmand %vm249_vm5, %vm251_vm3  ;;  %vm600_vm3 = vcmp.lt.s32.totalorder %v1430_v27, 127 }
  0xd4   : > { %v515_v51 = vmul.f32 %v513_v39, %v509_v47  ;;  %v516_v44 = vmul.f32 %v513_v39, %v510_v50  ;;  %vm1632_vm8 = vmand %vm248_vm14, %vm250_vm15  ;;  %vm569_vm14 = vcmp.lt.s32.totalorder %v1430_v27, 1 }
  0xd5   : > { %v520_v52 = vpop.permute.xlu1 %519  ;;  %vm572_vm15 = vmand %vm1632_vm8, %vm1959_vm4 }
  0xd6   : > { %v517_v46 = vadd.f32 %v515_v51, %v494_v36  ;;  %v518_v55 = vadd.f32 %v516_v44, %v495_v37  ;;  %vm573_vm5 = vmand %vm1636_vm0, %vm1957_vm7  ;;  %v582_v21 = vpop.permute.xlu0 %581 }
  0xd7   : > { %1162 = vset.pattern.permute.xlu1 %v1239_v7 }
  0xd8   : > { %933 = vperm.xlu1 %1162, %v1467_v43  }
  0xd9   : > { %v522_v56 = vpop.permute.xlu1 %521 }
  0xda   : > { %v524_v58 = vsel %vm523_vm1, %v520_v52, %v522_v56  ;;  %v525_v7 = vsel %vm523_vm1, %v522_v56, %v520_v52  ;;  %vm546_vm1 = vcmp.lt.s32.totalorder %v1430_v27, 2  ;;  %v599_v37 = vpop.permute.xlu0 %598 }
  0xdb   : > { %v532_v43 = vsel %vm526_vm6, %v525_v7, 0.0  ;;  %v533_v59 = vsel %vm527_vm9, %v524_v58, 0.0  ;;  %vm549_vm6 = vmand %vm1632_vm8, %vm272_vm11 }
  0xdc   : > { %v538_v54 = vmul.f32 %v536_v57, %v532_v43  ;;  %v539_v60 = vmul.f32 %v536_v57, %v533_v59  ;;  %1163 = vset.pattern.permute.xlu1 %v1230_v1  ;;  %vm550_vm9 = vmand %vm1636_vm0, %vm273_vm12 }
  0xdd   : > { %v543_v63 = vpop.permute.xlu1 %542  ;;  %951 = vperm.xlu1 %1163, %v948_v53  }
  0xde   : > { %v540_v4 = vadd.f32 %v538_v54, %v517_v46  ;;  %v541_v6 = vadd.f32 %v539_v60, %v518_v55 }
  0xe1   : > { %v545_v1 = vpop.permute.xlu1 %544 }
  0xe2   : > { %v547_v9 = vsel %vm546_vm1, %v543_v63, %v545_v1  ;;  %v548_v10 = vsel %vm546_vm1, %v545_v1, %v543_v63  ;;  %vm603_vm1 = vmand %vm1632_vm8, %vm1958_vm2 }
  0xe3   : > { %v555_v13 = vsel %vm549_vm6, %v548_v10, 0.0  ;;  %v556_v14 = vsel %vm550_vm9, %v547_v9, 0.0  ;;  %vm1978_vm6 = vcmp.lt.s32.totalorder %v1524_v2, 16 }
  0xe4   : > { %v561_v15 = vmul.f32 %v559_v8, %v555_v13  ;;  %v562_v16 = vmul.f32 %v559_v8, %v556_v14  ;;  %vm604_vm9 = vmand %vm1636_vm0, %vm1978_vm6 }
  0xe5   : > { %v566_v17 = vpop.permute.xlu1 %565 }
  0xe6   : > { %v563_v18 = vadd.f32 %v561_v15, %v540_v4  ;;  %v564_v19 = vadd.f32 %v562_v16, %v541_v6  ;;  %v255_v6 = vadd.s32 1, %v1441_v33 }
  0xe9   : > { %v568_v20 = vpop.permute.xlu1 %567 }
  0xea   : > { %v570_v22 = vsel %vm569_vm14, %v566_v17, %v568_v20  ;;  %v571_v23 = vsel %vm569_vm14, %v568_v20, %v566_v17  ;;  %vm623_vm14 = vcmp.lt.s32.totalorder %v1430_v27, 126 }
  0xeb   : > { %v578_v24 = vsel %vm572_vm15, %v571_v23, 0.0  ;;  %v579_v26 = vsel %vm573_vm5, %v570_v22, 0.0  ;;  %vm626_vm15 = vmand %vm1632_vm8, %vm1960_vm10  ;;  %vm256_vm8 = vcmp.ge.s32.totalorder %v254_v61, 0 }
  0xec   : > { %v584_v28 = vmul.f32 %v582_v21, %v578_v24  ;;  %v585_v29 = vmul.f32 %v582_v21, %v579_v26  ;;  %vm627_vm5 = vmand %vm1636_vm0, %vm305_vm13  ;;  %vm257_vm0 = vcmp.ge.s32.totalorder %v255_v6, 0 }
  0xed   : > { %v590_v30 = vpop.permute.xlu1 %589 }
  0xee   : > { %v586_v31 = vadd.f32 %v584_v28, %v563_v18  ;;  %v587_v34 = vadd.f32 %v585_v29, %v564_v19  ;;  %v592_v35 = vmul.f32 %v590_v30, %v1371_v3  ;;  %v593_v36 = vmul.f32 %v590_v30, %v1378_v5  ;;  %v620_v3 = vpop.permute.xlu0 %619 }
  0xf0   : > { %v594_v38 = vadd.f32 %v592_v35, %v586_v31  ;;  %v595_v39 = vadd.f32 %v593_v36, %v587_v34 }
  0xf1   : > { %v597_v42 = vpop.permute.xlu1 %596 }
  0xf2   : > { %v601_v45 = vsel %vm600_vm3, %v597_v42, %v599_v37  ;;  %v602_v47 = vsel %vm600_vm3, %v599_v37, %v597_v42  ;;  %v636_v57 = vpop.permute.xlu0 %635  ;;  %vm258_vm3 = vcmp.lt.s32.totalorder %v254_v61, 16 }
  0xf3   : > { %v609_v50 = vsel %vm603_vm1, %v601_v45, 0.0  ;;  %v610_v51 = vsel %vm604_vm9, %v602_v47, 0.0  ;;  %vm259_vm1 = vcmp.lt.s32.totalorder %v255_v6, 16  ;;  %vm1682_vm6 = vmand %vm256_vm8, %vm258_vm3  ;;  %vm669_vm8 = vcmp.lt.s32.totalorder %v1430_v27, 113 }
  0xf4   : > { %vm1686_vm9 = vmand %vm257_vm0, %vm259_vm1  ;;  %v262_v45 = vadd.s32 2, %v1439_v32  ;;  %vm692_vm1 = vcmp.lt.s32.totalorder %v1430_v27, 112  ;;  %v263_v32 = vadd.s32 2, %v1441_v33 }
  0xf5   : > { %v613_v5 = vpop.permute.xlu1 %612  ;;  %vm1713_vm3 = vmand %vm1682_vm6, %vm1959_vm4 }
  0xf6   : > { %v615_v44 = vmul.f32 %v613_v5, %v609_v50  ;;  %v616_v52 = vmul.f32 %v613_v5, %v610_v51  ;;  %v705_v26 = vpop.permute.xlu0 %704  ;;  %vm1721_vm0 = vmand %vm1686_vm9, %vm1957_vm7  ;;  %vm1989_vm7 = vcmp.lt.s32.totalorder %v1524_v2, 16 }
  0xf7   : > { %vm1755_vm4 = vmand %vm1682_vm6, %vm1960_vm10  ;;  %vm761_vm10 = vcmp.lt.s32.totalorder %v1430_v27, 98 }
  0xf8   : > { %v617_v46 = vadd.f32 %v615_v44, %v594_v38  ;;  %v618_v55 = vadd.f32 %v616_v52, %v595_v39 }
  0xf9   : > { %v622_v56 = vpop.permute.xlu1 %621 }
  0xfa   : > { %v624_v58 = vsel %vm623_vm14, %v620_v3, %v622_v56  ;;  %v625_v7 = vsel %vm623_vm14, %v622_v56, %v620_v3  ;;  %vm646_vm14 = vcmp.lt.s32.totalorder %v1430_v27, 114  ;;  %v728_v29 = vpop.permute.xlu0 %727 }
  0xfb   : > { %v632_v53 = vsel %vm626_vm15, %v624_v58, 0.0  ;;  %v633_v43 = vsel %vm627_vm5, %v625_v7, 0.0  ;;  %vm649_vm15 = vmand %vm1682_vm6, %vm272_vm11 }
  0xfc   : > { %v638_v59 = vmul.f32 %v636_v57, %v632_v53  ;;  %v639_v54 = vmul.f32 %v636_v57, %v633_v43  ;;  %vm650_vm5 = vmand %vm1686_vm9, %vm273_vm12 }
  0xfd   : > { %v659_v60 = vpop.permute.xlu1 %658 }
  0xfe   : > { %v640_v63 = vadd.f32 %v638_v59, %v617_v46  ;;  %v641_v4 = vadd.f32 %v639_v54, %v618_v55  ;;  %v1699_v31 = vpop.permute.xlu0 %750 }
 0x102   : > { %v1680_v1 = vpop.permute.xlu1 %681  ;;  %v1701_v35 = vpop.permute.xlu0 %773 }
 0x106   : > { %v643_v8 = vpop.permute.xlu1 %642  ;;  %v1703_v38 = vpop.permute.xlu0 %796 }
 0x10a   : > { %v645_v10 = vpop.permute.xlu1 %644  ;;  %v1706_v42 = vpop.permute.xlu0 %819 }
 0x10b   : > { %v647_v13 = vsel %vm646_vm14, %v643_v8, %v645_v10  ;;  %v648_v14 = vsel %vm646_vm14, %v645_v10, %v643_v8  ;;  %vm715_vm14 = vcmp.lt.s32.totalorder %v1430_v27, 111 }
 0x10c   : > { %v655_v15 = vsel %vm649_vm15, %v647_v13, 0.0  ;;  %v656_v16 = vsel %vm650_vm5, %v648_v14, 0.0  ;;  %vm264_vm15 = vcmp.ge.s32.totalorder %v262_v45, 0  ;;  %vm266_vm5 = vcmp.lt.s32.totalorder %v262_v45, 16 }
 0x10d   : > { %v661_v17 = vmul.f32 %v659_v60, %v655_v15  ;;  %v662_v18 = vmul.f32 %v659_v60, %v656_v16 }
 0x10e   : > { %v666_v19 = vpop.permute.xlu1 %665  ;;  %v1740_v57 = vpop.permute.xlu0 %842 }
 0x10f   : > { %v663_v20 = vadd.f32 %v661_v17, %v640_v63  ;;  %v664_v21 = vadd.f32 %v662_v18, %v641_v4 }
 0x112   : > { %v668_v22 = vpop.permute.xlu1 %667  ;;  %v1797_v17 = vpop.permute.xlu0 %865 }
 0x113   : > { %v670_v50 = vsel %vm669_vm8, %v666_v19, %v668_v22  ;;  %v671_v51 = vsel %vm669_vm8, %v668_v22, %v666_v19  ;;  %vm1736_vm8 = vmand %vm1682_vm6, %vm1958_vm2  ;;  %vm738_vm2 = vcmp.lt.s32.totalorder %v1430_v27, 110 }
 0x114   : > { %v678_v44 = vsel %vm1713_vm3, %v670_v50, 0.0  ;;  %v679_v52 = vsel %vm1721_vm0, %v671_v51, 0.0  ;;  %vm1746_vm3 = vmand %vm1686_vm9, %vm1989_vm7  ;;  %vm265_vm0 = vcmp.ge.s32.totalorder %v263_v32, 0 }
 0x115   : > { %v684_v59 = vmul.f32 %v1680_v1, %v678_v44  ;;  %v685_v54 = vmul.f32 %v1680_v1, %v679_v52  ;;  %vm1767_vm7 = vmand %vm264_vm15, %vm266_vm5  ;;  %vm807_vm5 = vcmp.lt.s32.totalorder %v1430_v27, 96 }
 0x116   : > { %v689_v23 = vpop.permute.xlu1 %688  ;;  %vm1792_vm15 = vmand %vm1767_vm7, %vm272_vm11  ;;  %vm2004_vm11 = vcmp.ge.s32.totalorder %v1458_v40, 0 }
 0x117   : > { %v686_v9 = vadd.f32 %v684_v59, %v663_v20  ;;  %v687_v18 = vadd.f32 %v685_v54, %v664_v21 }
 0x11a   : > { %v691_v24 = vpop.permute.xlu1 %690 }
 0x11b   : > { %v693_v46 = vsel %vm692_vm1, %v689_v23, %v691_v24  ;;  %v694_v55 = vsel %vm692_vm1, %v691_v24, %v689_v23  ;;  %vm267_vm1 = vcmp.lt.s32.totalorder %v263_v32, 16  ;;  %v827_v32 = vpop.permute.xlu0 %826 }
 0x11c   : > { %v701_v60 = vsel %vm1682_vm6, %v693_v46, 0.0  ;;  %v702_v63 = vsel %vm1686_vm9, %v694_v55, 0.0  ;;  %vm1784_vm6 = vmand %vm1686_vm9, %vm305_vm13 }
 0x11d   : > { %v707_v14 = vmul.f32 %v705_v26, %v701_v60  ;;  %v708_v15 = vmul.f32 %v705_v26, %v702_v63 }
 0x11e   : > { %v712_v28 = vpop.permute.xlu1 %711 }
 0x11f   : > { %v876_v4 = vpop.permute.xlu0 %875 }
 0x122   : > { %v714_v30 = vpop.permute.xlu1 %713 }
 0x123   : > { %v716_v7 = vsel %vm715_vm14, %v712_v28, %v714_v30  ;;  %v717_v53 = vsel %vm715_vm14, %v714_v30, %v712_v28  ;;  %vm1771_vm14 = vmand %vm265_vm0, %vm267_vm1  ;;  %v709_v30 = vadd.f32 %v707_v14, %v686_v9  ;;  %vm2013_vm1 = vcmp.lt.s32.totalorder %v1524_v2, 16 }
 0x124   : > { %v724_v1 = vsel %vm1736_vm8, %v716_v7, 0.0  ;;  %v725_v0 = vsel %vm1746_vm3, %v717_v53, 0.0  ;;  %vm1804_vm9 = vmand %vm1771_vm14, %vm273_vm12  ;;  %vm2007_vm8 = vcmp.ge.s32.totalorder %v1462_v41, 0  ;;  %vm2010_vm3 = vcmp.lt.s32.totalorder %v1519_v62, 16 }
 0x125   : > { %v730_v23 = vmul.f32 %v728_v29, %v724_v1  ;;  %v731_v24 = vmul.f32 %v728_v29, %v725_v0  ;;  %vm1820_vm12 = vmand %vm1767_vm7, %vm2004_vm11  ;;  %v889_v9 = vshrl.u32 %v225_v25, 7 }
 0x126   : > { %v735_v34 = vpop.permute.xlu1 %734  ;;  %vm1855_vm0 = vmand %vm1767_vm7, %vm2010_vm3 }
 0x127   : > { %v922_v28 = vsub.s32 2, %v889_v9 }
 0x12a   : > { %v737_v36 = vpop.permute.xlu1 %736 }
 0x12b   : > { %v739_v8 = vsel %vm738_vm2, %v735_v34, %v737_v36  ;;  %v740_v10 = vsel %vm738_vm2, %v737_v36, %v735_v34  ;;  %vm784_vm2 = vcmp.lt.s32.totalorder %v1430_v27, 97  ;;  %v710_v34 = vadd.f32 %v708_v15, %v687_v18 }
 0x12c   : > { %v747_v20 = vsel %vm1755_vm4, %v739_v8, 0.0  ;;  %v748_v49 = vsel %vm1784_vm6, %v740_v10, 0.0  ;;  %vm830_vm4 = vcmp.lt.s32.totalorder %v1430_v27, 95  ;;  %vm1865_vm6 = vmand %vm1771_vm14, %vm2013_vm1 }
 0x12d   : > { %v733_v5 = vadd.f32 %v731_v24, %v710_v34  ;;  %v890_v24 = vsub.s32 0, %v889_v9 }
 0x12e   : > { %v758_v37 = vpop.permute.xlu1 %757 }
 0x132   : > { %v760_v39 = vpop.permute.xlu1 %759 }
 0x133   : > { %v762_v19 = vsel %vm761_vm10, %v758_v37, %v760_v39  ;;  %v763_v22 = vsel %vm761_vm10, %v760_v39, %v758_v37  ;;  %vm1828_vm10 = vmand %vm1771_vm14, %vm2007_vm8  ;;  %v753_v37 = vmul.f32 %v1699_v31, %v747_v20  ;;  %v754_v39 = vmul.f32 %v1699_v31, %v748_v49  ;;  %v886_v49 = vpop.permute.xlu0 %885 }
 0x134   : > { %v770_v36 = vsel %vm1792_vm15, %v762_v19, 0.0  ;;  %v771_v41 = vsel %vm1804_vm9, %v763_v22, 0.0  ;;  %vm853_vm15 = vcmp.lt.s32.totalorder %v1430_v27, 94  ;;  %vm857_vm9 = vmand %vm1771_vm14, %vm305_vm13  ;;  %v906_v20 = vsub.s32 1, %v889_v9 }
 0x135   : > { %v776_v52 = vmul.f32 %v1701_v35, %v770_v36  ;;  %v777_v46 = vmul.f32 %v1701_v35, %v771_v41  ;;  %v756_v2 = vadd.f32 %v754_v39, %v733_v5 }
 0x136   : > { %v781_v3 = vpop.permute.xlu1 %780 }
 0x137   : > { %v779_v63 = vadd.f32 %v777_v46, %v756_v2 }
 0x13a   : > { %v783_v33 = vpop.permute.xlu1 %782 }
 0x13b   : > { %v785_v29 = vsel %vm784_vm2, %v781_v3, %v783_v33  ;;  %v786_v40 = vsel %vm784_vm2, %v783_v33, %v781_v3  ;;  %v732_v3 = vadd.f32 %v730_v23, %v709_v30  ;;  %vm2016_vm2 = vcmp.lt.s32.totalorder %v1531_v11, 16 }
 0x13c   : > { %v793_v50 = vsel %vm1820_vm12, %v785_v29, 0.0  ;;  %v794_v51 = vsel %vm1828_vm10, %v786_v40, 0.0 }
 0x13d   : > { %v755_v58 = vadd.f32 %v753_v37, %v732_v3  ;;  %v799_v7 = vmul.f32 %v1703_v38, %v793_v50  ;;  %v800_v53 = vmul.f32 %v1703_v38, %v794_v51 }
 0x13e   : > { %v804_v6 = vpop.permute.xlu1 %803 }
 0x13f   : > { %v778_v60 = vadd.f32 %v776_v52, %v755_v58  ;;  %v802_v0 = vadd.f32 %v800_v53, %v779_v63 }
 0x141   : > { %v801_v38 = vadd.f32 %v799_v7, %v778_v60 }
 0x142   : > { %v806_v26 = vpop.permute.xlu1 %805 }
 0x143   : > { %v808_v45 = vsel %vm807_vm5, %v804_v6, %v806_v26  ;;  %v809_v47 = vsel %vm807_vm5, %v806_v26, %v804_v6  ;;  %vm856_vm5 = vmand %vm1767_vm7, %vm2016_vm2  ;;  %v938_v26 = vsub.s32 3, %v889_v9 }
 0x144   : > { %v816_v33 = vsel %vm1767_vm7, %v808_v45, 0.0  ;;  %v817_v35 = vsel %vm1771_vm14, %v809_v47, 0.0  ;;  %v918_v45 = vpop.permute.xlu0 %917 }
 0x145   : > { %v822_v6 = vmul.f32 %v1706_v42, %v816_v33  ;;  %v823_v1 = vmul.f32 %v1706_v42, %v817_v35 }
 0x146   : > { %v829_v44 = vpop.permute.xlu1 %828 }
 0x147   : > { %v831_v62 = vsel %vm830_vm4, %v827_v32, %v829_v44  ;;  %v832_v56 = vsel %vm830_vm4, %v829_v44, %v827_v32  ;;  %v824_v42 = vadd.f32 %v822_v6, %v801_v38  ;;  %v825_v14 = vadd.f32 %v823_v1, %v802_v0 }
 0x148   : > { %v839_v43 = vsel %vm1855_vm0, %v831_v62, 0.0  ;;  %v840_v59 = vsel %vm1865_vm6, %v832_v56, 0.0 }
 0x149   : > { %v845_v8 = vmul.f32 %v1740_v57, %v839_v43  ;;  %v846_v10 = vmul.f32 %v1740_v57, %v840_v59 }
 0x14a   : > { %v850_v54 = vpop.permute.xlu1 %849 }
 0x14b   : > { %v847_v48 = vadd.f32 %v845_v8, %v824_v42  ;;  %v848_v12 = vadd.f32 %v846_v10, %v825_v14 }
 0x14e   : > { %v852_v13 = vpop.permute.xlu1 %851 }
 0x14f   : > { %v854_v27 = vsel %vm853_vm15, %v850_v54, %v852_v13  ;;  %v855_v15 = vsel %vm853_vm15, %v852_v13, %v850_v54 }
 0x150   : > { %v862_v11 = vsel %vm856_vm5, %v854_v27, 0.0  ;;  %v863_v16 = vsel %vm857_vm9, %v855_v15, 0.0 }
 0x151   : > { %v868_v18 = vmul.f32 %v1797_v17, %v862_v11  ;;  %v869_v57 = vmul.f32 %v1797_v17, %v863_v16 }
 0x152   : > { %v902_v21 = vpop.permute.xlu1 %901 }
 0x153   : > { %v870_v19 = vadd.f32 %v868_v18, %v847_v48  ;;  %v871_v61 = vadd.f32 %v869_v57, %v848_v12 }
 0x155   : > { %v878_v22 = vadd.f32 %v876_v4, %v870_v19  ;;  %v879_v23 = vadd.f32 %v876_v4, %v871_v61 }
 0x157   : > { %v880_v29 = vmax.f32 %v878_v22, 0.0  ;;  %v881_v25 = vmax.f32 %v879_v23, 0.0  ;;  %v934_v51 = vpop.permute.xlu1 %933 }
 0x159   : > { %v891_v40 = vrot.slane %v880_v29, %v890_v24  ;;  %v895_v30 = vrot.slane %v881_v25, %v890_v24  ;;  %v907_v34 = vrot.slane %v880_v29, %v906_v20  ;;  %v911_v17 = vrot.slane %v881_v25, %v906_v20 }
 0x15a   : > { %v939_v36 = vrot.slane %v880_v29, %v938_v26  ;;  %v943_v41 = vrot.slane %v881_v25, %v938_v26  ;;  %v923_v37 = vrot.slane %v880_v29, %v922_v28  ;;  %v927_v39 = vrot.slane %v881_v25, %v922_v28 }
 0x15b   : > { %v896_v47 = vmul.f32 %v891_v40, %v886_v49  ;;  %v897_v3 = vmul.f32 %v895_v30, %v886_v49  ;;  %v912_v5 = vmul.f32 %v907_v34, %v902_v21  ;;  %v913_v50 = vmul.f32 %v911_v17, %v902_v21 }
 0x15c   : > { %v928_v44 = vmul.f32 %v923_v37, %v918_v45  ;;  %v929_v52 = vmul.f32 %v927_v39, %v918_v45  ;;  %v944_v46 = vmul.f32 %v939_v36, %v934_v51  ;;  %v945_v55 = vmul.f32 %v943_v41, %v934_v51  ;;  %v952_v33 = vpop.permute.xlu1 %951 }
 0x15d   : > { %v914_v32 = vadd.f32 %v912_v5, %v896_v47  ;;  %v915_v31 = vadd.f32 %v913_v50, %v897_v3 }
 0x15f   : > { %v930_v62 = vadd.f32 %v928_v44, %v914_v32  ;;  %v931_v56 = vadd.f32 %v929_v52, %v915_v31 }
 0x161   : > { %v946_v35 = vadd.f32 %v944_v46, %v930_v62  ;;  %v947_v58 = vadd.f32 %v945_v55, %v931_v56 }
 0x163   : > { %v954_v2 = vadd.f32 %v952_v33, %v946_v35  ;;  %v955_v7 = vadd.f32 %v952_v33, %v947_v58 }
 0x165   : > { %956 = vst [vmem:[%s217_s13] sm:$0xff] %v954_v2  ;;  %957 = vst [vmem:[%s217_s13 + $0x8] sm:$0xff] %v955_v7 }
 0x166   : > { %1179 = shalt.err (!%p1176_p3)
}
 0x167   : > { %s1180_s6 = scalar_lea.hbm %s1906_s17, 256  ;;  %s1184_s9 = scalar_lea.hbm %s1955_s5, 512 }
 0x168   : > { %p1181_p4 = scmp.ne.s32.totalorder %s1906_s17, %s1180_s6  ;;  %p1185_p9 = scmp.lt.u32.totalorder %s1906_s17, %s1955_s5 }
 0x169   : > { %p1186_p10 = scmp.lt.u32.totalorder %s1184_s9, %s1180_s6  ;;  %p1188_p12 = scmp.lt.u32.totalorder %s1180_s6, %s1906_s17 }
 0x16a   : > { %p1182_p7 = pnand %p1181_p4, %p1348_p5 }
 0x16b   : > { %p1187_p11 = por %p1186_p10, %p1185_p9 }
 0x16c   : > { %p1183_p8 = pneg %p1182_p7 }
 0x16d   : > { %p1189_p13 = por %p1188_p12, %p1187_p11 }
 0x16f   : > { %p1190_p0 = pnand %p1189_p13, %p1183_p8 }
 0x171   : > { %1193 = shalt.err (!%p1190_p0)
}
 0x172   : > { %1046 = dma.vmem_to_hbm [thread:$0]  (%p1348_p5), %s1908_s14, 256, %s1906_s17, %s959_s22  }
 0x173 PF: > { %p1052_p1 = scmp.ge.s32.totalorder %s1228_s21, 2  ;;  %s985_s12 = sand.u32 1, %s1216_s18  }
 0x174   : > { %s986_s13 = scalar_lea.sflag [#allocation3], %s985_s12 }
 0x175   : > { %p1049_p2 = pnand %p1052_p1, %p1352_p6 }
 0x177   : > { %1211 = dma.done.wait (!%p1049_p2), %s986_s13, 256  }
 0x178   : > { %1213 = vsyncadd (!%p1049_p2), %s986_s13, 4294967040  ;;  %p15_p3 = scmp.ge.s32.totalorder %s1335_s24, 4   ;;  %s2017_s18 = smov %s1220_s19 }
 0x179   : > { %s2018_s19 = smov %s1224_s20  ;;  %s2019_s20 = smov %s1346_s27 }
 0x17a   : > { %s2020_s21 = smov %s1335_s24  ;;  %17 = sbr.rel (!%p15_p3) target bundleno = 3 (0x3), region = 75 }
 0x181   :  { %991 = vsyncpa [#allocation3], 1 }
 0x182   :  { %993 = vsyncpa [#allocation3 + $0x1], 1 }

</bundles_post_ra>
